<compile_context>
chip_gen: v7x
topology: tpu7x:2x2x1
jax: 0.10.0
libtpu: 0.0.40
codegen_flags: <defaults>
</compile_context>

<pallas_src>
import functools

import jax
import jax.numpy as jnp
from jax.experimental import pallas as pl
from jax.experimental.pallas import tpu as pltpu


def _round_up(x, m):
    return ((x + m - 1) // m) * m


def _vmem_capacity_bytes():
    """Queried VMEM capacity; conservative 64 MiB (v7x) if unavailable."""
    try:
        cap = int(pltpu.get_tpu_info().vmem_capacity_bytes)
        if cap > 0:
            return cap
    except Exception:
        pass
    return 64 << 20


def _pick_batch_tile(batch, n_feat, weight_vmem_bytes, act_itemsize,
                     *, max_tb=1024, min_steps=4):
    """Largest sublane-aligned batch tile that (a) fits the VMEM budget,
    (b) leaves >= min_steps grid steps when batch allows (megacore sharding +
    DMA/compute overlap), (c) never shrinks below ~128 rows just to add steps.
    """
    if batch <= 16:
        return _round_up(max(batch, 1), 8)
    budget = int(0.75 * _vmem_capacity_bytes())       # headroom for Mosaic
    # Per-row VMEM: double-buffered in + out tiles, plus ~3 f32 temporaries
    # (x0, x_l, w) that stay live once TB*N exceeds the vreg file.
    per_row = (2 + 2) * n_feat * act_itemsize + 3 * n_feat * 4
    avail = budget - weight_vmem_bytes - (4 << 20)
    cap = max(8, min(max_tb, avail // max(per_row, 1)))
    # Keep the grid at >= 2 steps (ideally >= min_steps), floor ~128 rows.
    steps_clamp = max(batch // min_steps, min(128, batch // 2))
    cap = min(cap, max(8, steps_clamp))
    return max(8, (cap // 8) * 8)


def _dcn_kernel(x_ref, *rest, num_layers, refs_per_layer):
    """All cross layers fused on one lane-dense (TB, N) batch tile.

    Ref order: x_ref, per-layer weights (dense: M, b | low-rank: V_t, W_t, b),
    o_ref.  Matmul dtype is the weights' stored dtype (pre-cast in wrapper);
    bias + cross/residual epilogue are f32.
    """
    o_ref = rest[-1]
    w_refs = rest[:-1]

    x0 = x_ref[...].astype(jnp.float32)                          # (TB, N)
    xl = x0
    for layer in range(num_layers):
        refs = w_refs[refs_per_layer * layer: refs_per_layer * (layer + 1)]
        b_ref = refs[-1]                                         # (1, N) f32
        if refs_per_layer == 2:                                  # dense (N, N)
            m_ref = refs[0]
            w = jnp.dot(xl.astype(m_ref.dtype), m_ref[...],
                        preferred_element_type=jnp.float32)      # (TB, N)
        else:                                                    # low-rank
            vt_ref, wt_ref = refs[0], refs[1]                    # (N,r), (r,N)
            v = jnp.dot(xl.astype(vt_ref.dtype), vt_ref[...],
                        preferred_element_type=jnp.float32)      # (TB, r)
            w = jnp.dot(v.astype(wt_ref.dtype), wt_ref[...],
                        preferred_element_type=jnp.float32)      # (TB, N)
        xl = x0 * (w + b_ref[...]) + xl                          # f32 epilogue
    o_ref[...] = xl.astype(o_ref.dtype)


def _prepare_weights(params, n_pad, *, mxu_dtype, use_dense):
    """Per-layer kernel weights: pre-transposed, lane-padded, pre-cast.

    params: list of (V_t (N, r), W_t (r, N), b (1, N)).
    Returns (flat_weights, refs_per_layer).
    """
    flat = []
    for vt, wt, b in params:
        n = vt.shape[0]
        vt = jnp.asarray(vt, jnp.float32)
        wt = jnp.asarray(wt, jnp.float32)
        b2 = jnp.asarray(b, jnp.float32).reshape(1, n)
        if n_pad != n:
            # Zero padding is exact: padded rows/cols contribute 0 and padded
            # output columns stay 0 through every layer.
            vt = jnp.pad(vt, ((0, n_pad - n), (0, 0)))
            wt = jnp.pad(wt, ((0, 0), (0, n_pad - n)))
            b2 = jnp.pad(b2, ((0, 0), (0, n_pad - n)))
        if use_dense:
            m = jnp.dot(vt, wt)                                  # (N, N) in f32
            flat.extend([m.astype(mxu_dtype), b2])
        else:
            flat.extend([vt.astype(mxu_dtype), wt.astype(mxu_dtype), b2])
    return flat, (2 if use_dense else 3)


def interaction_dcn_forward(combined_values, params, *, batch_tile=None,
                            mxu_dtype=jnp.float32, use_dense=None,
                            dense_max_width=256):
    """InteractionDCNArch forward.

    combined_values: (B, N) float32 with N = (F+1)*D.
    params: list of (V_t (N, r), W_t (r, N), b (1, N)) per cross layer.
    """
    x = jnp.asarray(combined_values)
    B, N = x.shape
    L = len(params)
    r = params[0][0].shape[1]

    # Lane-dense feature dim (avoids masked partial stores on the write path).
    n_pad = _round_up(N, 128)
    if use_dense is None:
        use_dense = n_pad <= dense_max_width

    flat_weights, refs_per_layer = _prepare_weights(
        params, n_pad, mxu_dtype=mxu_dtype, use_dense=use_dense)
    weight_bytes = sum(int(w.size) * w.dtype.itemsize for w in flat_weights)

    # Batch tile (VMEM-budget-derived) + sublane padding.
    tb = batch_tile if batch_tile is not None else _pick_batch_tile(
        B, n_pad, weight_bytes, x.dtype.itemsize)
    b_pad = _round_up(B, tb)
    if (b_pad, n_pad) != (B, N):
        x = jnp.pad(x, ((0, b_pad - B), (0, n_pad - N)))

    # VMEM budget: single-buffered weights + double-buffered x/out tiles
    # + ~3 f32 live temporaries (x0, x_l, w).
    act_bytes = (2 + 2) * tb * n_pad * x.dtype.itemsize
    temp_bytes = 3 * tb * n_pad * 4
    vmem_limit = weight_bytes + act_bytes + temp_bytes + (4 << 20)
    vmem_limit = int(min(max(vmem_limit, 32 << 20),
                         0.9 * _vmem_capacity_bytes()))

    if use_dense:
        layer_flops = 2 * b_pad * n_pad * n_pad + 3 * b_pad * n_pad
    else:
        layer_flops = 4 * b_pad * n_pad * r + 3 * b_pad * n_pad
    cost = pl.CostEstimate(
        flops=L * layer_flops,
        transcendentals=0,
        bytes_accessed=2 * b_pad * n_pad * x.dtype.itemsize + weight_bytes,
    )

    kernel = functools.partial(_dcn_kernel, num_layers=L,
                               refs_per_layer=refs_per_layer)

    def _call(weight_pipeline_mode):
        in_specs = [pl.BlockSpec((tb, n_pad), lambda i: (i, 0))]
        for w in flat_weights:
            # Constant index map -> fetched once, resident across batch tiles.
            if weight_pipeline_mode is None:
                spec = pl.BlockSpec(w.shape, lambda i: (0, 0))
            else:
                spec = pl.BlockSpec(w.shape, lambda i: (0, 0),
                                    pipeline_mode=weight_pipeline_mode)
            in_specs.append(spec)
        return pl.pallas_call(
            kernel,
            out_shape=jax.ShapeDtypeStruct((b_pad, n_pad), x.dtype),
            grid=(b_pad // tb,),
            in_specs=in_specs,
            out_specs=pl.BlockSpec((tb, n_pad), lambda i: (i, 0)),
            input_output_aliases={0: 0},    # output reuses x's HBM buffer
            compiler_params=pltpu.CompilerParams(
                dimension_semantics=("parallel",),
                vmem_limit_bytes=vmem_limit,
            ),
            cost_estimate=cost,
        )(x, *flat_weights)

    try:
        # Preferred: single-buffer the never-changing weights (halves their
        # VMEM footprint; matters most on v7x's 64 MiB VMEM).
        out = _call(pl.Buffered(1))
    except Exception:
        # Portability fallback for jax versions without Buffered(1) support.
        out = _call(None)

    if (b_pad, n_pad) != (B, N):
        out = out[:B, :N]
    return out


def init_lowrank_crossnet_params(key, in_features, num_layers, low_rank):
    """Match torchrec LowRankCrossNet init: xavier_normal_ W/V, zero bias.

    torch shapes: W_kernels (N, r), V_kernels (r, N), bias (N,).
    Stored pre-transposed / lane-friendly for the kernel:
      V_t = V^T (N, r), W_t = W^T (r, N), b (1, N).
    """
    N, rk = in_features, low_rank
    std = (2.0 / (N + rk)) ** 0.5            # xavier_normal, gain=1
    params = []
    for _ in range(num_layers):
        key, k_w, k_v = jax.random.split(key, 3)
        w = std * jax.random.normal(k_w, (N, rk), jnp.float32)   # torch W_kernels
        v = std * jax.random.normal(k_v, (rk, N), jnp.float32)   # torch V_kernels
        params.append((v.T, w.T, jnp.zeros((1, N), jnp.float32)))
    return params


def _reference(x, params):
    """Pure-JAX reference of LowRankCrossNet.forward (sanity check)."""
    x0 = x
    xl = x0
    for vt, wt, b in params:
        xl = x0 * (xl @ vt @ wt + b) + xl
    return xl


if __name__ == "__main__":
    # Small DLRMv2-ish shapes: D=32, F=3 -> N = (F+1)*D = 128 (lane-dense),
    # 3 cross layers, low-rank dim 16, batch 256 (>= 2 "parallel" grid steps).
    B = 256
    D = 32           # embedding_dim
    F = 3            # num_sparse_features
    N = (F + 1) * D  # F*D + D = 128
    num_layers = 3
    low_rank = 16

    key = jax.random.PRNGKey(0)
    key, k_x = jax.random.split(key)
    combined_values = jax.random.normal(k_x, (B, N), jnp.float32)
    params = init_lowrank_crossnet_params(key, N, num_layers, low_rank)

    ref = _reference(combined_values, params)

    # Default path: dense-collapsed layers (auto-selected since N <= 256).
    out = jax.block_until_ready(interaction_dcn_forward(combined_values, params))
    assert out.shape == (B, N)
    assert jnp.allclose(out, ref, rtol=1e-4, atol=1e-4), (
        "dense path max abs diff = %f" % float(jnp.max(jnp.abs(out - ref))))

    # Low-rank path (what production-size N uses); exercised for coverage.
    out_lr = jax.block_until_ready(
        interaction_dcn_forward(combined_values, params, use_dense=False))
    assert jnp.allclose(out_lr, ref, rtol=1e-4, atol=1e-4), (
        "low-rank path max abs diff = %f" % float(jnp.max(jnp.abs(out_lr - ref))))

    print("KERNEL_OK")
</pallas_src>

<mosaic_0001>
module attributes {stable_mosaic.version = 11 : i64} {
  func.func @_dcn_kernel(%arg0: i32, %arg1: memref<128x128xf32, #tpu.memory_space<vmem>>, %arg2: memref<128x128xf32, #tpu.memory_space<vmem>>, %arg3: memref<1x128xf32, #tpu.memory_space<vmem>>, %arg4: memref<128x128xf32, #tpu.memory_space<vmem>>, %arg5: memref<1x128xf32, #tpu.memory_space<vmem>>, %arg6: memref<128x128xf32, #tpu.memory_space<vmem>>, %arg7: memref<1x128xf32, #tpu.memory_space<vmem>>, %arg8: memref<128x128xf32, #tpu.memory_space<vmem>>) attributes {dimension_semantics = [#tpu.dimension_semantics<parallel>], iteration_bounds = array<i64: 2>, scalar_prefetch = 0 : i64, scratch_operands = 0 : i64, tpu.core_type = #tpu.core_type<tc>, window_params = [{transform_indices = @transform_0, window_bounds = array<i64: 128, 128>}, {pipeline_mode = #tpu.pipeline_mode<synchronous>, transform_indices = @transform_1, window_bounds = array<i64: 128, 128>}, {pipeline_mode = #tpu.pipeline_mode<synchronous>, transform_indices = @transform_2, window_bounds = array<i64: 1, 128>}, {pipeline_mode = #tpu.pipeline_mode<synchronous>, transform_indices = @transform_3, window_bounds = array<i64: 128, 128>}, {pipeline_mode = #tpu.pipeline_mode<synchronous>, transform_indices = @transform_4, window_bounds = array<i64: 1, 128>}, {pipeline_mode = #tpu.pipeline_mode<synchronous>, transform_indices = @transform_5, window_bounds = array<i64: 128, 128>}, {pipeline_mode = #tpu.pipeline_mode<synchronous>, transform_indices = @transform_6, window_bounds = array<i64: 1, 128>}, {transform_indices = @transform_7, window_bounds = array<i64: 128, 128>}]} {
    %c0 = arith.constant 0 : index
    %c0_0 = arith.constant 0 : index
    %0 = vector.load %arg1[%c0, %c0_0] : memref<128x128xf32, #tpu.memory_space<vmem>>, vector<128x128xf32>
    %c0_1 = arith.constant 0 : index
    %c0_2 = arith.constant 0 : index
    %1 = vector.load %arg2[%c0_1, %c0_2] : memref<128x128xf32, #tpu.memory_space<vmem>>, vector<128x128xf32>
    %cst = arith.constant dense<0.000000e+00> : vector<128x128xf32>
    %2 = tpu.matmul %0, %1, %cst {dimension_numbers = #tpu.dot_dimension_numbers<[1], [0], [0], [1], [0, 0, 1, 1], [], []>} : vector<128x128xf32>, vector<128x128xf32>, vector<128x128xf32> -> vector<128x128xf32>
    %c0_3 = arith.constant 0 : index
    %c0_4 = arith.constant 0 : index
    %3 = vector.load %arg3[%c0_3, %c0_4] : memref<1x128xf32, #tpu.memory_space<vmem>>, vector<1x128xf32>
    %4 = vector.broadcast %3 : vector<1x128xf32> to vector<128x128xf32>
    %5 = arith.addf %2, %4 : vector<128x128xf32>
    %6 = arith.mulf %0, %5 : vector<128x128xf32>
    %7 = arith.addf %6, %0 : vector<128x128xf32>
    %c0_5 = arith.constant 0 : index
    %c0_6 = arith.constant 0 : index
    %8 = vector.load %arg4[%c0_5, %c0_6] : memref<128x128xf32, #tpu.memory_space<vmem>>, vector<128x128xf32>
    %cst_7 = arith.constant dense<0.000000e+00> : vector<128x128xf32>
    %9 = tpu.matmul %7, %8, %cst_7 {dimension_numbers = #tpu.dot_dimension_numbers<[1], [0], [0], [1], [0, 0, 1, 1], [], []>} : vector<128x128xf32>, vector<128x128xf32>, vector<128x128xf32> -> vector<128x128xf32>
    %c0_8 = arith.constant 0 : index
    %c0_9 = arith.constant 0 : index
    %10 = vector.load %arg5[%c0_8, %c0_9] : memref<1x128xf32, #tpu.memory_space<vmem>>, vector<1x128xf32>
    %11 = vector.broadcast %10 : vector<1x128xf32> to vector<128x128xf32>
    %12 = arith.addf %9, %11 : vector<128x128xf32>
    %13 = arith.mulf %0, %12 : vector<128x128xf32>
    %14 = arith.addf %13, %7 : vector<128x128xf32>
    %c0_10 = arith.constant 0 : index
    %c0_11 = arith.constant 0 : index
    %15 = vector.load %arg6[%c0_10, %c0_11] : memref<128x128xf32, #tpu.memory_space<vmem>>, vector<128x128xf32>
    %cst_12 = arith.constant dense<0.000000e+00> : vector<128x128xf32>
    %16 = tpu.matmul %14, %15, %cst_12 {dimension_numbers = #tpu.dot_dimension_numbers<[1], [0], [0], [1], [0, 0, 1, 1], [], []>} : vector<128x128xf32>, vector<128x128xf32>, vector<128x128xf32> -> vector<128x128xf32>
    %c0_13 = arith.constant 0 : index
    %c0_14 = arith.constant 0 : index
    %17 = vector.load %arg7[%c0_13, %c0_14] : memref<1x128xf32, #tpu.memory_space<vmem>>, vector<1x128xf32>
    %18 = vector.broadcast %17 : vector<1x128xf32> to vector<128x128xf32>
    %19 = arith.addf %16, %18 : vector<128x128xf32>
    %20 = arith.mulf %0, %19 : vector<128x128xf32>
    %21 = arith.addf %20, %14 : vector<128x128xf32>
    %c0_15 = arith.constant 0 : index
    %c0_16 = arith.constant 0 : index
    %22 = vector.load %arg8[%c0_15, %c0_16] : memref<128x128xf32, #tpu.memory_space<vmem>>, vector<128x128xf32>
    tpu.vector_store %arg8[%c0_15, %c0_16], %21 {strides = array<i32>} : memref<128x128xf32, #tpu.memory_space<vmem>>, vector<128x128xf32>,
    return
  }
  func.func @transform_0(%arg0: i32) -> (i32, i32) {
    %c0_i32 = arith.constant 0 : i32
    %c0_i32_0 = arith.constant 0 : i32
    return %arg0, %c0_i32 : i32, i32
  }
  func.func @transform_1(%arg0: i32) -> (i32, i32) {
    %c0_i32 = arith.constant 0 : i32
    %c0_i32_0 = arith.constant 0 : i32
    %c0_i32_1 = arith.constant 0 : i32
    return %c0_i32, %c0_i32_0 : i32, i32
  }
  func.func @transform_2(%arg0: i32) -> (i32, i32) {
    %c0_i32 = arith.constant 0 : i32
    %c0_i32_0 = arith.constant 0 : i32
    %c0_i32_1 = arith.constant 0 : i32
    return %c0_i32, %c0_i32_0 : i32, i32
  }
  func.func @transform_3(%arg0: i32) -> (i32, i32) {
    %c0_i32 = arith.constant 0 : i32
    %c0_i32_0 = arith.constant 0 : i32
    %c0_i32_1 = arith.constant 0 : i32
    return %c0_i32, %c0_i32_0 : i32, i32
  }
  func.func @transform_4(%arg0: i32) -> (i32, i32) {
    %c0_i32 = arith.constant 0 : i32
    %c0_i32_0 = arith.constant 0 : i32
    %c0_i32_1 = arith.constant 0 : i32
    return %c0_i32, %c0_i32_0 : i32, i32
  }
  func.func @transform_5(%arg0: i32) -> (i32, i32) {
    %c0_i32 = arith.constant 0 : i32
    %c0_i32_0 = arith.constant 0 : i32
    %c0_i32_1 = arith.constant 0 : i32
    return %c0_i32, %c0_i32_0 : i32, i32
  }
  func.func @transform_6(%arg0: i32) -> (i32, i32) {
    %c0_i32 = arith.constant 0 : i32
    %c0_i32_0 = arith.constant 0 : i32
    %c0_i32_1 = arith.constant 0 : i32
    return %c0_i32, %c0_i32_0 : i32, i32
  }
  func.func @transform_7(%arg0: i32) -> (i32, i32) {
    %c0_i32 = arith.constant 0 : i32
    %c0_i32_0 = arith.constant 0 : i32
    return %arg0, %c0_i32 : i32, i32
  }
}

module attributes {stable_mosaic.version = 11 : i64} {
  func.func @_dcn_kernel(%arg0: i32, %arg1: memref<128x128xf32, #tpu.memory_space<vmem>>, %arg2: memref<128x128xf32, #tpu.memory_space<vmem>>, %arg3: memref<1x128xf32, #tpu.memory_space<vmem>>, %arg4: memref<128x128xf32, #tpu.memory_space<vmem>>, %arg5: memref<1x128xf32, #tpu.memory_space<vmem>>, %arg6: memref<128x128xf32, #tpu.memory_space<vmem>>, %arg7: memref<1x128xf32, #tpu.memory_space<vmem>>, %arg8: memref<128x128xf32, #tpu.memory_space<vmem>>) attributes {dimension_semantics = [#tpu.dimension_semantics<parallel>], iteration_bounds = array<i64: 2>, scalar_prefetch = 0 : i64, scratch_operands = 0 : i64, tpu.core_type = #tpu.core_type<tc>, window_params = [{transform_indices = @transform_0, window_bounds = array<i64: 128, 128>}, {pipeline_mode = #tpu.pipeline_mode<synchronous>, transform_indices = @transform_1, window_bounds = array<i64: 128, 128>}, {pipeline_mode = #tpu.pipeline_mode<synchronous>, transform_indices = @transform_2, window_bounds = array<i64: 1, 128>}, {pipeline_mode = #tpu.pipeline_mode<synchronous>, transform_indices = @transform_3, window_bounds = array<i64: 128, 128>}, {pipeline_mode = #tpu.pipeline_mode<synchronous>, transform_indices = @transform_4, window_bounds = array<i64: 1, 128>}, {pipeline_mode = #tpu.pipeline_mode<synchronous>, transform_indices = @transform_5, window_bounds = array<i64: 128, 128>}, {pipeline_mode = #tpu.pipeline_mode<synchronous>, transform_indices = @transform_6, window_bounds = array<i64: 1, 128>}, {transform_indices = @transform_7, window_bounds = array<i64: 128, 128>}]} {
    %c0 = arith.constant 0 : index
    %c0_0 = arith.constant 0 : index
    %0 = vector.load %arg1[%c0, %c0_0] : memref<128x128xf32, #tpu.memory_space<vmem>>, vector<128x128xf32>
    %c0_1 = arith.constant 0 : index
    %c0_2 = arith.constant 0 : index
    %1 = vector.load %arg2[%c0_1, %c0_2] : memref<128x128xf32, #tpu.memory_space<vmem>>, vector<128x128xf32>
    %cst = arith.constant dense<0.000000e+00> : vector<128x128xf32>
    %2 = tpu.matmul %0, %1, %cst {dimension_numbers = #tpu.dot_dimension_numbers<[1], [0], [0], [1], [0, 0, 1, 1], [], []>} : vector<128x128xf32>, vector<128x128xf32>, vector<128x128xf32> -> vector<128x128xf32>
    %c0_3 = arith.constant 0 : index
    %c0_4 = arith.constant 0 : index
    %3 = vector.load %arg3[%c0_3, %c0_4] : memref<1x128xf32, #tpu.memory_space<vmem>>, vector<1x128xf32>
    %4 = vector.broadcast %3 : vector<1x128xf32> to vector<128x128xf32>
    %5 = arith.addf %2, %4 : vector<128x128xf32>
    %6 = arith.mulf %0, %5 : vector<128x128xf32>
    %7 = arith.addf %6, %0 : vector<128x128xf32>
    %c0_5 = arith.constant 0 : index
    %c0_6 = arith.constant 0 : index
    %8 = vector.load %arg4[%c0_5, %c0_6] : memref<128x128xf32, #tpu.memory_space<vmem>>, vector<128x128xf32>
    %cst_7 = arith.constant dense<0.000000e+00> : vector<128x128xf32>
    %9 = tpu.matmul %7, %8, %cst_7 {dimension_numbers = #tpu.dot_dimension_numbers<[1], [0], [0], [1], [0, 0, 1, 1], [], []>} : vector<128x128xf32>, vector<128x128xf32>, vector<128x128xf32> -> vector<128x128xf32>
    %c0_8 = arith.constant 0 : index
    %c0_9 = arith.constant 0 : index
    %10 = vector.load %arg5[%c0_8, %c0_9] : memref<1x128xf32, #tpu.memory_space<vmem>>, vector<1x128xf32>
    %11 = vector.broadcast %10 : vector<1x128xf32> to vector<128x128xf32>
    %12 = arith.addf %9, %11 : vector<128x128xf32>
    %13 = arith.mulf %0, %12 : vector<128x128xf32>
    %14 = arith.addf %13, %7 : vector<128x128xf32>
    %c0_10 = arith.constant 0 : index
    %c0_11 = arith.constant 0 : index
    %15 = vector.load %arg6[%c0_10, %c0_11] : memref<128x128xf32, #tpu.memory_space<vmem>>, vector<128x128xf32>
    %cst_12 = arith.constant dense<0.000000e+00> : vector<128x128xf32>
    %16 = tpu.matmul %14, %15, %cst_12 {dimension_numbers = #tpu.dot_dimension_numbers<[1], [0], [0], [1], [0, 0, 1, 1], [], []>} : vector<128x128xf32>, vector<128x128xf32>, vector<128x128xf32> -> vector<128x128xf32>
    %c0_13 = arith.constant 0 : index
    %c0_14 = arith.constant 0 : index
    %17 = vector.load %arg7[%c0_13, %c0_14] : memref<1x128xf32, #tpu.memory_space<vmem>>, vector<1x128xf32>
    %18 = vector.broadcast %17 : vector<1x128xf32> to vector<128x128xf32>
    %19 = arith.addf %16, %18 : vector<128x128xf32>
    %20 = arith.mulf %0, %19 : vector<128x128xf32>
    %21 = arith.addf %20, %14 : vector<128x128xf32>
    %c0_15 = arith.constant 0 : index
    %c0_16 = arith.constant 0 : index
    %22 = vector.load %arg8[%c0_15, %c0_16] : memref<128x128xf32, #tpu.memory_space<vmem>>, vector<128x128xf32>
    tpu.vector_store %arg8[%c0_15, %c0_16], %21 {strides = array<i32>} : memref<128x128xf32, #tpu.memory_space<vmem>>, vector<128x128xf32>,
    return
  }
  func.func @transform_0(%arg0: i32) -> (i32, i32) {
    %c0_i32 = arith.constant 0 : i32
    %c0_i32_0 = arith.constant 0 : i32
    return %arg0, %c0_i32 : i32, i32
  }
  func.func @transform_1(%arg0: i32) -> (i32, i32) {
    %c0_i32 = arith.constant 0 : i32
    %c0_i32_0 = arith.constant 0 : i32
    %c0_i32_1 = arith.constant 0 : i32
    return %c0_i32, %c0_i32_0 : i32, i32
  }
  func.func @transform_2(%arg0: i32) -> (i32, i32) {
    %c0_i32 = arith.constant 0 : i32
    %c0_i32_0 = arith.constant 0 : i32
    %c0_i32_1 = arith.constant 0 : i32
    return %c0_i32, %c0_i32_0 : i32, i32
  }
  func.func @transform_3(%arg0: i32) -> (i32, i32) {
    %c0_i32 = arith.constant 0 : i32
    %c0_i32_0 = arith.constant 0 : i32
    %c0_i32_1 = arith.constant 0 : i32
    return %c0_i32, %c0_i32_0 : i32, i32
  }
  func.func @transform_4(%arg0: i32) -> (i32, i32) {
    %c0_i32 = arith.constant 0 : i32
    %c0_i32_0 = arith.constant 0 : i32
    %c0_i32_1 = arith.constant 0 : i32
    return %c0_i32, %c0_i32_0 : i32, i32
  }
  func.func @transform_5(%arg0: i32) -> (i32, i32) {
    %c0_i32 = arith.constant 0 : i32
    %c0_i32_0 = arith.constant 0 : i32
    %c0_i32_1 = arith.constant 0 : i32
    return %c0_i32, %c0_i32_0 : i32, i32
  }
  func.func @transform_6(%arg0: i32) -> (i32, i32) {
    %c0_i32 = arith.constant 0 : i32
    %c0_i32_0 = arith.constant 0 : i32
    %c0_i32_1 = arith.constant 0 : i32
    return %c0_i32, %c0_i32_0 : i32, i32
  }
  func.func @transform_7(%arg0: i32) -> (i32, i32) {
    %c0_i32 = arith.constant 0 : i32
    %c0_i32_0 = arith.constant 0 : i32
    return %arg0, %c0_i32 : i32, i32
  }
}

</mosaic_0001>

<bundles_post_ra>
// kernel: tpu_custom_call.1
= control target key start
LH: loop header
LB: loop body
LE: loop exit
PB: predicated region body
PF: predicated region fallthrough
CT: control target
= control target key end

     0   :  { %12 = vsyncpa [#allocation3], 0  ;;  %s2281_s0 = inlined_call_operand.hbm [shape: f32[256,128], index: 0, kind: input, shape index: {}, may-alias: {0,7}]   ;;  %s2282_s1 = inlined_call_operand.vmem [shape: f32[128,128], index: 1, kind: input, shape index: {}]   ;;  %s2283_s2 = inlined_call_operand.vmem [shape: f32[1,128], index: 2, kind: input, shape index: {}]   ;;  %s2284_s3 = inlined_call_operand.vmem [shape: f32[128,128], index: 3, kind: input, shape index: {}]   ;;  %s2285_s4 = inlined_call_operand.vmem [shape: f32[1,128], index: 4, kind: input, shape index: {}]   ;;  %s2286_s5 = inlined_call_operand.vmem [shape: f32[128,128], index: 5, kind: input, shape index: {}]   ;;  %s2287_s6 = inlined_call_operand.vmem [shape: f32[1,128], index: 6, kind: input, shape index: {}]   ;;  %s2288_s7 = inlined_call_operand.hbm [shape: f32[256,128], index: 7, kind: output, shape index: {}, may-alias: {0,7}]  }
   0x1   :  { %14 = vsyncpa [#allocation3 + $0x1], 0 }
   0x2   :  { %15 = vsyncpa [#allocation4], 0 }
   0x3   :  { %17 = vsyncpa [#allocation4 + $0x1], 0  ;;  %s1607_s24 = smov 0   ;;  %s1609_s25 = smov 0  }
   0x4   :  { %s1611_s26 = smov 0   ;;  %s1613_s27 = smov 0  }
   0x5 LB: > { %s1628_s28 = sadd.s32 4294967295, %s1559_s27   ;;  %s1018_s29 = sadd.s32 4294967294, %s1559_s27   ;;  %s1559_s27 = sphi %s1613_s27, %s2303_s27   ;;  %s1555_s26 = sphi %s1611_s26, %s2302_s26   ;;  %s1551_s25 = sphi %s1609_s25, %s2301_s25   ;;  %s1547_s24 = sphi %s1607_s24, %s2300_s24  }
   0x6   : > { %s1632_s30 = sadd.s32 1, %s1559_s27   ;;  %s30_s8 = sadd.s32 1, %s1555_s26 }
   0x7   : > { %s27_s9 = ssub.s32 %s1559_s27, %s1632_s30  ;;  %p37_p0 = scmp.ne.s32.totalorder %s1555_s26, %s1551_s25 }
   0x8   : > { %p28_p1 = scmp.eq.s32.totalorder %s27_s9, 0  ;;  %p38_p2 = scmp.eq.s32.totalorder %s1559_s27, 0 }
   0x9   : > { %p43_p3 = scmp.ne.s32.totalorder %s1551_s25, %s1547_s24  ;;  %p44_p4 = scmp.eq.s32.totalorder %s1628_s28, 0 }
   0xa   : > { %s1644_s10 = scalar_select %p28_p1, %s1555_s26, %s30_s8  }
   0xb   : > { %p1646_p5 = por %p38_p2, %p37_p0  ;;  %p1650_p6 = por %p44_p4, %p43_p3 }
   0xc   : > { %p193_p7 = scmp.eq.s32.totalorder %s1628_s28, 1  ;;  %p199_p8 = scmp.eq.s32.totalorder %s1018_s29, 1 }
   0xd   : > { %p1425_p10 = scmp.lt.s32.totalorder %s1559_s27, 2  ;;  %s237_s15 = sand.u32 1, %s1555_s26  }
   0xe   : > { %p1657_p11 = por %p193_p7, %p37_p0  ;;  %p1661_p12 = por %p199_p8, %p43_p3 }
   0xf   : > { %s1035_s16 = sshll.u32 %s1559_s27, 11  ;;  %s1021_s17 = sshll.u32 %s237_s15, 7 }
  0x10   : > { %s2293_s13 = scalar_select %p1657_p11, 1, 0 }
  0x11   : > { %s2294_s14 = scalar_select %p1661_p12, 1, 0 }
  0x12   : > { %s1670_s20 = scalar_lea.hbm %s2281_s0, %s1035_s16  ;;  %s241_s21 = scalar_lea.vmem [#allocation2], %s1021_s17 }
  0x13   : > { %s248_s22 = sshll.u32 %s241_s21, 4  ;;  %p1674_p13 = pnand %p1425_p10, %p1646_p5  ;;  %s1678_s22 = int_to_ptr.vmem [resolvable:$true] %s248_s22 }
  0x14   : > { %s1680_s29 = scalar_lea.sflag [#allocation3], %s237_s15  ;;  %s1463_s8 = scalar_lea.hbm %s1670_s20, 2048 }
  0x15   : > { %p1464_p0 = scmp.ne.s32.totalorder %s1670_s20, %s1463_s8  ;;  %p1465_p1 = pneg %p1674_p13 }
  0x16   : > { %s1468_s16 = scalar_lea.hbm %s2281_s0, 4096  ;;  %p1469_p4 = scmp.lt.u32.totalorder %s1670_s20, %s2281_s0 }
  0x17   : > { %p1466_p2 = pnand %p1465_p1, %p1464_p0  ;;  %p1470_p5 = scmp.lt.u32.totalorder %s1468_s16, %s1463_s8 }
  0x18   : > { %p1472_p8 = scmp.lt.u32.totalorder %s1463_s8, %s1670_s20 }
  0x19   : > { %p1467_p3 = pneg %p1466_p2  ;;  %p1471_p7 = por %p1470_p5, %p1469_p4 }
  0x1b   : > { %p1473_p10 = por %p1472_p8, %p1471_p7 }
  0x1d   : > { %p1474_p9 = pnand %p1473_p10, %p1467_p3 }
  0x1f   : > { %1477 = shalt.err (!%p1474_p9)
}
  0x20   : > { %s1478_s15 = scalar_lea.vmem %s1678_s22, 2048  ;;  %s1561_s19 = smov [#allocation2]  }
  0x21   : > { %p1479_p0 = scmp.ne.s32.totalorder %s1678_s22, %s1478_s15  ;;  %s1483_s21 = sshll.u32 %s1561_s19, 4  ;;  %s1484_s21 = int_to_ptr.vmem [resolvable:$false] %s1483_s21 }
  0x22   : > { %s1485_s9 = scalar_lea.vmem %s1484_s21, 4096  ;;  %p1486_p11 = scmp.lt.s32.totalorder %s1678_s22, %s1484_s21 }
  0x23   : > { %p1481_p2 = pnand %p1479_p0, %p1465_p1  ;;  %p1487_p4 = scmp.lt.s32.totalorder %s1485_s9, %s1478_s15 }
  0x25   : > { %p1482_p12 = pneg %p1481_p2  ;;  %p1488_p5 = por %p1487_p4, %p1486_p11 }
  0x27   : > { %p1489_p7 = pnand %p1488_p5, %p1482_p12 }
  0x29   : > { %1492 = shalt.err (!%p1489_p7)
}
  0x2a   : > { %s1562_s8 = smov 128   ;;  %s1563_s11 = smov 8  }
  0x2b   : > { %1420 = dma.hbm_to_vmem [thread:$0]  (!%p1674_p13), %s1670_s20, 2048, %s1678_s22, %s1680_s29, %s1562_s8, %s1562_s8, %s1563_s11  }
  0x2c   : > { %p1024_p9 = scmp.ge.s32.totalorder %s1559_s27, 1  ;;  %p256_p1 = scmp.lt.s32.totalorder %s1559_s27, 3 }
  0x2e   : > { %p257_p3 = pnand %p1024_p9, %p256_p1 }
  0x2f   : > { %s1711_s16 = sand.u32 (!%p257_p3), 1, %s1551_s25  }
  0x30   : > { %260 = sbr.rel (%p257_p3) target bundleno = 793 (0x319), region = 48  ;;  %s2290_s17 = sshll.u32 (!%p257_p3), %s1711_s16, 7 }
  0x31   : > { %s263_s18 = scalar_lea.sflag (!%p257_p3), [#allocation3], %s1711_s16  ;;  %s1717_s15 = scalar_lea.vmem (!%p257_p3), [#allocation2], %s2290_s17 }
  0x37   : > { %1538 = dma.done.wait (%p1650_p6), %s263_s18, 2048  }
  0x38   : > { %1540 = vsyncadd (%p1650_p6), %s263_s18, 4294965248  ;;  %v315_v0 = vld [vmem:[%s2282_s1] sm:$0xff]  ;;  %v316_v1 = vld [vmem:[%s2282_s1 + $0x8] sm:$0xff]  ;;  %s1036_s21 = sshll.u32 %s1628_s28, 11  ;;  %s932_s28 = scalar_lea.sflag [#allocation4], %s1711_s16 }
  0x39   : > { %v317_v2 = vld [vmem:[%s2282_s1 + $0x10] sm:$0xff]  ;;  %v1301_v3 = vpack.c.bf16 %v316_v1, %v315_v0  ;;  %v318_v4 = vld [vmem:[%s2282_s1 + $0x18] sm:$0xff]  ;;  %v319_v6 = vld [vmem:[%s2282_s1 + $0x20] sm:$0xff]  ;;  %s2232_s11 = scalar_lea.hbm %s2288_s7, %s1036_s21  ;;  %p2297_p11 = scmp.ne.s32.totalorder %s2293_s13, 0 }
  0x3a   : > { %v1305_v5 = vpack.c.bf16 %v318_v4, %v317_v2  ;;  %v320_v7 = vld [vmem:[%s2282_s1 + $0x28] sm:$0xff]  ;;  %v1742_v9 = vld [vmem:[%s1717_s15] sm:$0xff]  ;;  %v321_v10 = vld [vmem:[%s2282_s1 + $0x30] sm:$0xff]  ;;  %s1564_s20 = smov [#allocation5]  }
  0x3b   : > { %1302 = vmatprep.subr.bf16.mxu0 %v1301_v3  ;;  %v1309_v8 = vpack.c.bf16 %v320_v7, %v319_v6  ;;  %v322_v11 = vld [vmem:[%s2282_s1 + $0x38] sm:$0xff]  ;;  %1165 = vmatprep.mubr.f32.mxu0 %v1742_v9  ;;  %v323_v13 = vld [vmem:[%s2282_s1 + $0x40] sm:$0xff]  ;;  %v324_v14 = vld [vmem:[%s2282_s1 + $0x48] sm:$0xff]  ;;  %s1497_s17 = sshll.u32 %s1564_s20, 4  ;;  %s1498_s17 = int_to_ptr.vmem [resolvable:$false] %s1497_s17 }
  0x3c   : > { %1304 = vmatpush3.bf16.msra.mxu0 %v1301_v3  ;;  %v1313_v12 = vpack.c.bf16 %v322_v11, %v321_v10  ;;  %v515_v15 = vld [vmem:[%s2284_s3] sm:$0xff]  ;;  %v516_v16 = vld [vmem:[%s2284_s3 + $0x8] sm:$0xff]  ;;  %v517_v17 = vld [vmem:[%s2284_s3 + $0x10] sm:$0xff]  ;;  %v1317_v21 = vpack.c.bf16 %v324_v14, %v323_v13  ;;  %s1499_s22 = scalar_lea.vmem %s1498_s17, 4096 }
  0x3d   : > { %1306 = vmatprep.subr.bf16.mxu0 %v1305_v5  ;;  %v518_v18 = vld [vmem:[%s2284_s3 + $0x18] sm:$0xff]  ;;  %v1333_v19 = vpack.c.bf16 %v516_v16, %v515_v15  ;;  %v519_v22 = vld [vmem:[%s2284_s3 + $0x20] sm:$0xff]  ;;  %v520_v23 = vld [vmem:[%s2284_s3 + $0x28] sm:$0xff] }
  0x3e   : > { %v1337_v20 = vpack.c.bf16 %v518_v18, %v517_v17  ;;  %v325_v24 = vld [vmem:[%s2282_s1 + $0x50] sm:$0xff]  ;;  %v326_v25 = vld [vmem:[%s2282_s1 + $0x58] sm:$0xff]  ;;  %v1341_v26 = vpack.c.bf16 %v520_v23, %v519_v22  ;;  %v327_v30 = vld [vmem:[%s2282_s1 + $0x60] sm:$0xff] }
  0x3f   : > { %1334 = vmatprep.subr.bf16.mxu1 %v1333_v19  ;;  %v1321_v27 = vpack.c.bf16 %v326_v25, %v325_v24  ;;  %v521_v28 = vld [vmem:[%s2284_s3 + $0x30] sm:$0xff]  ;;  %v522_v29 = vld [vmem:[%s2284_s3 + $0x38] sm:$0xff]  ;;  %v328_v31 = vld [vmem:[%s2282_s1 + $0x68] sm:$0xff] }
  0x40   : > { %1308 = vmatpush3.bf16.msra.mxu0 %v1305_v5  ;;  %1336 = vmatpush3.bf16.msra.mxu1 %v1333_v19  ;;  %v1345_v32 = vpack.c.bf16 %v522_v29, %v521_v28  ;;  %v1325_v33 = vpack.c.bf16 %v328_v31, %v327_v30  ;;  %v523_v34 = vld [vmem:[%s2284_s3 + $0x40] sm:$0xff]  ;;  %v524_v35 = vld [vmem:[%s2284_s3 + $0x48] sm:$0xff]  ;;  %v329_v36 = vld [vmem:[%s2282_s1 + $0x70] sm:$0xff] }
  0x41   : > { %1310 = vmatprep.subr.bf16.mxu0 %v1309_v8  ;;  %1338 = vmatprep.subr.bf16.mxu1 %v1337_v20  ;;  %v330_v37 = vld [vmem:[%s2282_s1 + $0x78] sm:$0xff]  ;;  %v1349_v38 = vpack.c.bf16 %v524_v35, %v523_v34  ;;  %v525_v40 = vld [vmem:[%s2284_s3 + $0x50] sm:$0xff]  ;;  %v1812_v43 = vld [vmem:[%s1717_s15 + $0x8] sm:$0xff] }
  0x42   : > { %v1329_v39 = vpack.c.bf16 %v330_v37, %v329_v36  ;;  %v526_v41 = vld [vmem:[%s2284_s3 + $0x58] sm:$0xff]  ;;  %v1815_v44 = vld [vmem:[%s1717_s15 + $0x10] sm:$0xff]  ;;  %v1823_v46 = vld [vmem:[%s1717_s15 + $0x20] sm:$0xff] }
  0x43   : > { %v1353_v42 = vpack.c.bf16 %v526_v41, %v525_v40  ;;  %v1820_v45 = vld [vmem:[%s1717_s15 + $0x18] sm:$0xff]  ;;  %v1828_v47 = vld [vmem:[%s1717_s15 + $0x28] sm:$0xff]  ;;  %v1831_v48 = vld [vmem:[%s1717_s15 + $0x30] sm:$0xff] }
  0x44   : > { %1312 = vmatpush3.bf16.msra.mxu0 %v1309_v8  ;;  %1340 = vmatpush3.bf16.msra.mxu1 %v1337_v20  ;;  %v1836_v49 = vld [vmem:[%s1717_s15 + $0x38] sm:$0xff]  ;;  %v1839_v50 = vld [vmem:[%s1717_s15 + $0x40] sm:$0xff]  ;;  %v1844_v51 = vld [vmem:[%s1717_s15 + $0x48] sm:$0xff] }
  0x45   : > { %1314 = vmatprep.subr.bf16.mxu0 %v1313_v12  ;;  %1342 = vmatprep.subr.bf16.mxu1 %v1341_v26  ;;  %v1847_v52 = vld [vmem:[%s1717_s15 + $0x50] sm:$0xff]  ;;  %v1852_v53 = vld [vmem:[%s1717_s15 + $0x58] sm:$0xff]  ;;  %v1855_v54 = vld [vmem:[%s1717_s15 + $0x60] sm:$0xff] }
  0x46   : > { %v1860_v55 = vld [vmem:[%s1717_s15 + $0x68] sm:$0xff]  ;;  %v1863_v56 = vld [vmem:[%s1717_s15 + $0x70] sm:$0xff]  ;;  %v1868_v57 = vld [vmem:[%s1717_s15 + $0x78] sm:$0xff]  ;;  %s2296_s15 = sshll.u32 %s1711_s16, 7 }
  0x47   : > { %v527_v58 = vld [vmem:[%s2284_s3 + $0x60] sm:$0xff]  ;;  %v528_v59 = vld [vmem:[%s2284_s3 + $0x68] sm:$0xff]  ;;  %v529_v61 = vld [vmem:[%s2284_s3 + $0x70] sm:$0xff]  ;;  %s2172_s19 = scalar_lea.vmem [#allocation5], %s2296_s15 }
  0x48   : > { %1316 = vmatpush3.bf16.msra.mxu0 %v1313_v12  ;;  %1344 = vmatpush3.bf16.msra.mxu1 %v1341_v26  ;;  %v1357_v60 = vpack.c.bf16 %v528_v59, %v527_v58  ;;  %v530_v62 = vld [vmem:[%s2284_s3 + $0x78] sm:$0xff]  ;;  %v715_v0 = vld [vmem:[%s2286_s5] sm:$0xff]  ;;  %v716_v1 = vld [vmem:[%s2286_s5 + $0x8] sm:$0xff]  ;;  %s945_s9 = sshll.u32 %s2172_s19, 4  ;;  %s2234_s9 = int_to_ptr.vmem [resolvable:$true] %s945_s9 }
  0x49   : > { %1318 = vmatprep.subr.bf16.mxu0 %v1317_v21  ;;  %1346 = vmatprep.subr.bf16.mxu1 %v1345_v32  ;;  %v1361_v63 = vpack.c.bf16 %v530_v62, %v529_v61  ;;  %v717_v2 = vld [vmem:[%s2286_s5 + $0x10] sm:$0xff]  ;;  %v1365_v3 = vpack.c.bf16 %v716_v1, %v715_v0  ;;  %v718_v4 = vld [vmem:[%s2286_s5 + $0x18] sm:$0xff]  ;;  %v719_v6 = vld [vmem:[%s2286_s5 + $0x20] sm:$0xff]  ;;  %s1493_s18 = scalar_lea.vmem %s2234_s9, 2048  ;;  %p1500_p8 = scmp.lt.s32.totalorder %s2234_s9, %s1498_s17 }
  0x4a   : > { %v1369_v5 = vpack.c.bf16 %v718_v4, %v717_v2  ;;  %v720_v7 = vld [vmem:[%s2286_s5 + $0x28] sm:$0xff]  ;;  %v721_v10 = vld [vmem:[%s2286_s5 + $0x30] sm:$0xff]  ;;  %v722_v11 = vld [vmem:[%s2286_s5 + $0x38] sm:$0xff]  ;;  %p1494_p6 = scmp.ne.s32.totalorder %s2234_s9, %s1493_s18  ;;  %p1501_p10 = scmp.lt.s32.totalorder %s1499_s22, %s1493_s18 }
  0x4b   : > { %v1901_v8 = vpack.c.bf16 %v720_v7, %v719_v6  ;;  %v1910_v12 = vpack.c.bf16 %v722_v11, %v721_v10  ;;  %v723_v13 = vld [vmem:[%s2286_s5 + $0x40] sm:$0xff]  ;;  %v724_v14 = vld [vmem:[%s2286_s5 + $0x48] sm:$0xff]  ;;  %v725_v16 = vld [vmem:[%s2286_s5 + $0x50] sm:$0xff] }
  0x4c   : > { %1320 = vmatpush3.bf16.msra.mxu0 %v1317_v21  ;;  %1348 = vmatpush3.bf16.msra.mxu1 %v1345_v32  ;;  %v1920_v15 = vpack.c.bf16 %v724_v14, %v723_v13  ;;  %v726_v17 = vld [vmem:[%s2286_s5 + $0x58] sm:$0xff]  ;;  %v1938_v19 = vld [vmem:[%s2283_s2] ss:$0 sm:$0xff]  ;;  %p1495_p12 = pnand %p1494_p6, %p2297_p11  ;;  %p1502_p0 = por %p1501_p10, %p1500_p8 }
  0x4d   : > { %1322 = vmatprep.subr.bf16.mxu0 %v1321_v27  ;;  %1350 = vmatprep.subr.bf16.mxu1 %v1349_v38  ;;  %v1930_v18 = vpack.c.bf16 %v726_v17, %v725_v16 }
  0x4e   : > { %p1496_p13 = pneg %p1495_p12 }
  0x50   : > { %1324 = vmatpush3.bf16.msra.mxu0 %v1321_v27  ;;  %1352 = vmatpush3.bf16.msra.mxu1 %v1349_v38  ;;  %p1503_p2 = pnand %p1502_p0, %p1496_p13 }
  0x51   : > { %1326 = vmatprep.subr.bf16.mxu0 %v1325_v33  ;;  %1354 = vmatprep.subr.bf16.mxu1 %v1353_v42 }
  0x54   : > { %1328 = vmatpush3.bf16.msra.mxu0 %v1325_v33  ;;  %1356 = vmatpush3.bf16.msra.mxu1 %v1353_v42 }
  0x55   : > { %1330 = vmatprep.subr.bf16.mxu0 %v1329_v39  ;;  %1358 = vmatprep.subr.bf16.mxu1 %v1357_v60 }
  0x58   : > { %1332 = vmatpush3.bf16.msra.mxu0 %v1329_v39  ;;  %1360 = vmatpush3.bf16.msra.mxu1 %v1357_v60 }
  0x59   : > { %1362 = vmatprep.subr.bf16.mxu1 %v1361_v63  ;;  %1366 = vmatprep.subr.bf16.mxu0 %v1365_v3 }
  0x5b   : > { %1166 = vmatmul.mubr.f32.vlgmr.msra.gmra.mrb[0].mxu0 %v1812_v43 }
  0x5c   : > { %1168 = vmatprep.mubr.f32.mxu0 %v1815_v44  ;;  %1364 = vmatpush3.bf16.msra.mxu1 %v1361_v63 }
  0x5d   : > { %1397 = vmatprep.subr.bf16.mxu1 %v1365_v3  ;;  %1368 = vmatpush3.bf16.msra.mxu0 %v1365_v3 }
  0x5e   : > { %1370 = vmatprep.subr.bf16.mxu0 %v1369_v5 }
  0x5f   : > { %1169 = vmatmul.mubr.f32.gmra.mrb[2].mxu0 %v1820_v45 }
  0x60   : > { %1171 = vmatprep.mubr.f32.mxu0 %v1823_v46 }
  0x61   : > { %1372 = vmatpush3.bf16.msra.mxu0 %v1369_v5 }
  0x62   : > { %1374 = vmatprep.subr.bf16.mxu0 %v1901_v8 }
  0x63   : > { %1172 = vmatmul.mubr.f32.gmra.mrb[4].mxu0 %v1828_v47 }
  0x64   : > { %1174 = vmatprep.mubr.f32.mxu0 %v1831_v48 }
  0x65   : > { %1376 = vmatpush3.bf16.msra.mxu0 %v1901_v8 }
  0x66   : > { %1378 = vmatprep.subr.bf16.mxu0 %v1910_v12 }
  0x67   : > { %1175 = vmatmul.mubr.f32.gmra.mrb[6].mxu0 %v1836_v49 }
  0x68   : > { %1177 = vmatprep.mubr.f32.mxu0 %v1839_v50 }
  0x69   : > { %1380 = vmatpush3.bf16.msra.mxu0 %v1910_v12 }
  0x6a   : > { %1382 = vmatprep.subr.bf16.mxu0 %v1920_v15 }
  0x6b   : > { %1178 = vmatmul.mubr.f32.gmra.mrb[8].mxu0 %v1844_v51 }
  0x6c   : > { %1180 = vmatprep.mubr.f32.mxu0 %v1847_v52 }
  0x6d   : > { %1384 = vmatpush3.bf16.msra.mxu0 %v1920_v15 }
  0x6e   : > { %1386 = vmatprep.subr.bf16.mxu0 %v1930_v18 }
  0x6f   : > { %1181 = vmatmul.mubr.f32.gmra.mrb[10].mxu0 %v1852_v53 }
  0x70   : > { %1183 = vmatprep.mubr.f32.mxu0 %v1855_v54 }
  0x71   : > { %1388 = vmatpush3.bf16.msra.mxu0 %v1930_v18 }
  0x73   : > { %1184 = vmatmul.mubr.f32.gmra.mrb[12].mxu0 %v1860_v55 }
  0x74   : > { %1186 = vmatprep.mubr.f32.mxu0 %v1863_v56 }
  0x77   : > { %1187 = vmatmul.mubr.f32.gmra.mrb[14].mxu0 %v1868_v57 }
 0x12e   : > { %v1167_v20 = vpop.f32.mrb[0].mxu0 }
 0x12f   : > { %v410_v21 = vadd.f32 %v1167_v20, %v1938_v19  ;;  %v404_v22 = vpop.f32.mrb[1].mxu0 }
 0x130   : > { %v405_v23 = vadd.f32 %v1938_v19, %v404_v22 }
 0x131   : > { %v484_v24 = vmul.f32 %v410_v21, %v1812_v43 }
 0x132   : > { %v483_v25 = vmul.f32 %v405_v23, %v1742_v9  ;;  %v1170_v26 = vpop.f32.mrb[2].mxu0 }
 0x133   : > { %v420_v27 = vadd.f32 %v1170_v26, %v1938_v19  ;;  %v414_v28 = vpop.f32.mrb[3].mxu0  ;;  %v1951_v32 = vadd.f32 %v484_v24, %v1812_v43 }
 0x134   : > { %v415_v29 = vadd.f32 %v1938_v19, %v414_v28  ;;  %v1947_v30 = vadd.f32 %v483_v25, %v1742_v9 }
 0x135   : > { %v486_v31 = vmul.f32 %v420_v27, %v1820_v45 }
 0x136   : > { %v485_v33 = vmul.f32 %v415_v29, %v1815_v44  ;;  %v1173_v34 = vpop.f32.mrb[4].mxu0  ;;  %1221 = vmatprep.mubr.f32.mxu1 %v1947_v30 }
 0x137   : > { %v430_v35 = vadd.f32 %v1173_v34, %v1938_v19  ;;  %v424_v36 = vpop.f32.mrb[5].mxu0  ;;  %1222 = vmatmul.mubr.f32.vlgmr.msra.gmra.mrb[0].mxu1 %v1951_v32  ;;  %v1963_v40 = vadd.f32 %v486_v31, %v1820_v45 }
 0x138   : > { %v425_v37 = vadd.f32 %v1938_v19, %v424_v36  ;;  %v1959_v38 = vadd.f32 %v485_v33, %v1815_v44  ;;  %1405 = vmatpush3.bf16.msra.mxu1 %v1365_v3 }
 0x139   : > { %v488_v39 = vmul.f32 %v430_v35, %v1828_v47  ;;  %1398 = vmatprep.subr.bf16.mxu1 %v1369_v5 }
 0x13a   : > { %v487_v41 = vmul.f32 %v425_v37, %v1823_v46  ;;  %v1176_v42 = vpop.f32.mrb[6].mxu0  ;;  %1224 = vmatprep.mubr.f32.mxu1 %v1959_v38 }
 0x13b   : > { %v440_v58 = vadd.f32 %v1176_v42, %v1938_v19  ;;  %v434_v59 = vpop.f32.mrb[7].mxu0  ;;  %1225 = vmatmul.mubr.f32.gmra.mrb[2].mxu1 %v1963_v40  ;;  %v1975_v63 = vadd.f32 %v488_v39, %v1828_v47 }
 0x13c   : > { %v435_v60 = vadd.f32 %v1938_v19, %v434_v59  ;;  %v1971_v61 = vadd.f32 %v487_v41, %v1823_v46  ;;  %1406 = vmatpush3.bf16.msra.mxu1 %v1369_v5  ;;  %v728_v41 = vld [vmem:[%s2286_s5 + $0x68] sm:$0xff]  ;;  %v730_v59 = vld [vmem:[%s2286_s5 + $0x78] sm:$0xff] }
 0x13d   : > { %v490_v62 = vmul.f32 %v440_v58, %v1836_v49  ;;  %1399 = vmatprep.subr.bf16.mxu1 %v1901_v8  ;;  %v729_v58 = vld [vmem:[%s2286_s5 + $0x70] sm:$0xff] }
 0x13e   : > { %v489_v0 = vmul.f32 %v435_v60, %v1831_v48  ;;  %v1179_v1 = vpop.f32.mrb[8].mxu0  ;;  %1227 = vmatprep.mubr.f32.mxu1 %v1971_v61  ;;  %v1393_v60 = vpack.c.bf16 %v730_v59, %v729_v58 }
 0x13f   : > { %v450_v2 = vadd.f32 %v1179_v1, %v1938_v19  ;;  %v444_v3 = vpop.f32.mrb[9].mxu0  ;;  %1228 = vmatmul.mubr.f32.gmra.mrb[4].mxu1 %v1975_v63  ;;  %v1989_v7 = vadd.f32 %v490_v62, %v1836_v49  ;;  %v2059_v62 = vld [vmem:[%s2285_s4] ss:$0 sm:$0xff] }
 0x140   : > { %v445_v4 = vadd.f32 %v1938_v19, %v444_v3  ;;  %v1984_v5 = vadd.f32 %v489_v0, %v1831_v48  ;;  %1407 = vmatpush3.bf16.msra.mxu1 %v1901_v8 }
 0x141   : > { %v492_v6 = vmul.f32 %v450_v2, %v1844_v51  ;;  %1400 = vmatprep.subr.bf16.mxu1 %v1910_v12 }
 0x142   : > { %v491_v10 = vmul.f32 %v445_v4, %v1839_v50  ;;  %v1182_v11 = vpop.f32.mrb[10].mxu0  ;;  %1230 = vmatprep.mubr.f32.mxu1 %v1984_v5 }
 0x143   : > { %v460_v13 = vadd.f32 %v1182_v11, %v1938_v19  ;;  %v454_v14 = vpop.f32.mrb[11].mxu0  ;;  %1231 = vmatmul.mubr.f32.gmra.mrb[6].mxu1 %v1989_v7  ;;  %v2003_v20 = vadd.f32 %v492_v6, %v1844_v51 }
 0x144   : > { %v455_v16 = vadd.f32 %v1938_v19, %v454_v14  ;;  %v1998_v8 = vadd.f32 %v491_v10, %v1839_v50  ;;  %1408 = vmatpush3.bf16.msra.mxu1 %v1910_v12 }
 0x145   : > { %v494_v17 = vmul.f32 %v460_v13, %v1852_v53  ;;  %1401 = vmatprep.subr.bf16.mxu1 %v1920_v15 }
 0x146   : > { %v493_v21 = vmul.f32 %v455_v16, %v1847_v52  ;;  %v1185_v22 = vpop.f32.mrb[12].mxu0  ;;  %1233 = vmatprep.mubr.f32.mxu1 %v1998_v8 }
 0x147   : > { %v470_v23 = vadd.f32 %v1185_v22, %v1938_v19  ;;  %v464_v24 = vpop.f32.mrb[13].mxu0  ;;  %1234 = vmatmul.mubr.f32.gmra.mrb[8].mxu1 %v2003_v20  ;;  %v2017_v27 = vadd.f32 %v494_v17, %v1852_v53 }
 0x148   : > { %v465_v25 = vadd.f32 %v1938_v19, %v464_v24  ;;  %v2012_v12 = vadd.f32 %v493_v21, %v1847_v52  ;;  %1409 = vmatpush3.bf16.msra.mxu1 %v1920_v15 }
 0x149   : > { %v496_v26 = vmul.f32 %v470_v23, %v1860_v55  ;;  %1402 = vmatprep.subr.bf16.mxu1 %v1930_v18 }
 0x14a   : > { %v495_v28 = vmul.f32 %v465_v25, %v1855_v54  ;;  %v1188_v29 = vpop.f32.mrb[14].mxu0  ;;  %1236 = vmatprep.mubr.f32.mxu1 %v2012_v12 }
 0x14b   : > { %v480_v31 = vadd.f32 %v1188_v29, %v1938_v19  ;;  %v474_v33 = vpop.f32.mrb[15].mxu0  ;;  %1237 = vmatmul.mubr.f32.gmra.mrb[10].mxu1 %v2017_v27  ;;  %v2031_v36 = vadd.f32 %v496_v26, %v1860_v55 }
 0x14c   : > { %v475_v34 = vadd.f32 %v1938_v19, %v474_v33  ;;  %v2026_v15 = vadd.f32 %v495_v28, %v1855_v54  ;;  %1410 = vmatpush3.bf16.msra.mxu1 %v1930_v18  ;;  %v727_v18 = vld [vmem:[%s2286_s5 + $0x60] sm:$0xff] }
 0x14d   : > { %v498_v35 = vmul.f32 %v480_v31, %v1868_v57  ;;  %v1389_v42 = vpack.c.bf16 %v728_v41, %v727_v18 }
 0x14e   : > { %v497_v37 = vmul.f32 %v475_v34, %v1863_v56  ;;  %1239 = vmatprep.mubr.f32.mxu1 %v2026_v15 }
 0x14f   : > { %1240 = vmatmul.mubr.f32.gmra.mrb[12].mxu1 %v2031_v36  ;;  %v2040_v19 = vadd.f32 %v498_v35, %v1868_v57  ;;  %1390 = vmatprep.subr.bf16.mxu0 %v1389_v42 }
 0x150   : > { %v2037_v39 = vadd.f32 %v497_v37, %v1863_v56  ;;  %1403 = vmatprep.subr.bf16.mxu1 %v1389_v42  ;;  %1392 = vmatpush3.bf16.msra.mxu0 %v1389_v42 }
 0x151   : > { %1411 = vmatpush3.bf16.msra.mxu1 %v1389_v42  ;;  %1394 = vmatprep.subr.bf16.mxu0 %v1393_v60 }
 0x152   : > { %1242 = vmatprep.mubr.f32.mxu1 %v2037_v39  ;;  %1404 = vmatprep.subr.bf16.mxu1 %v1393_v60 }
 0x153   : > { %1243 = vmatmul.mubr.f32.gmra.mrb[14].mxu1 %v2040_v19 }
 0x154   : > { %1396 = vmatpush3.bf16.msra.mxu0 %v1393_v60 }
 0x155   : > { %1412 = vmatpush3.bf16.msra.mxu1 %v1393_v60 }
 0x20a   : > { %v1223_v0 = vpop.f32.mrb[0].mxu1 }
 0x20b   : > { %v610_v1 = vadd.f32 %v1223_v0, %v2059_v62  ;;  %v604_v2 = vpop.f32.mrb[1].mxu1 }
 0x20c   : > { %v605_v3 = vadd.f32 %v2059_v62, %v604_v2 }
 0x20d   : > { %v684_v4 = vmul.f32 %v610_v1, %v1812_v43 }
 0x20e   : > { %v683_v6 = vmul.f32 %v605_v3, %v1742_v9  ;;  %v1226_v10 = vpop.f32.mrb[2].mxu1 }
 0x20f   : > { %v620_v11 = vadd.f32 %v1226_v10, %v2059_v62  ;;  %v614_v13 = vpop.f32.mrb[3].mxu1  ;;  %v2071_v17 = vadd.f32 %v684_v4, %v1951_v32 }
 0x210   : > { %v615_v14 = vadd.f32 %v2059_v62, %v614_v13  ;;  %v2068_v16 = vadd.f32 %v683_v6, %v1947_v30 }
 0x211   : > { %v686_v21 = vmul.f32 %v620_v11, %v1820_v45 }
 0x212   : > { %v685_v22 = vmul.f32 %v615_v14, %v1815_v44  ;;  %v1229_v23 = vpop.f32.mrb[4].mxu1  ;;  %1277 = vmatprep.mubr.f32.mxu0 %v2068_v16 }
 0x213   : > { %v630_v24 = vadd.f32 %v1229_v23, %v2059_v62  ;;  %v624_v25 = vpop.f32.mrb[5].mxu1  ;;  %1278 = vmatmul.mubr.f32.vlgmr.msra.gmra.mrb[16].mxu0 %v2071_v17  ;;  %v2084_v28 = vadd.f32 %v686_v21, %v1963_v40 }
 0x214   : > { %v625_v26 = vadd.f32 %v2059_v62, %v624_v25  ;;  %v2080_v30 = vadd.f32 %v685_v22, %v1959_v38 }
 0x215   : > { %v688_v32 = vmul.f32 %v630_v24, %v1828_v47 }
 0x216   : > { %v687_v29 = vmul.f32 %v625_v26, %v1823_v46  ;;  %v1232_v31 = vpop.f32.mrb[6].mxu1  ;;  %1280 = vmatprep.mubr.f32.mxu0 %v2080_v30 }
 0x217   : > { %v640_v33 = vadd.f32 %v1232_v31, %v2059_v62  ;;  %v634_v34 = vpop.f32.mrb[7].mxu1  ;;  %1281 = vmatmul.mubr.f32.gmra.mrb[18].mxu0 %v2084_v28  ;;  %v2096_v40 = vadd.f32 %v688_v32, %v1975_v63 }
 0x218   : > { %v635_v35 = vadd.f32 %v2059_v62, %v634_v34  ;;  %v2092_v38 = vadd.f32 %v687_v29, %v1971_v61 }
 0x219   : > { %v690_v37 = vmul.f32 %v640_v33, %v1836_v49 }
 0x21a   : > { %v689_v18 = vmul.f32 %v635_v35, %v1831_v48  ;;  %v1235_v41 = vpop.f32.mrb[8].mxu1  ;;  %1283 = vmatprep.mubr.f32.mxu0 %v2092_v38 }
 0x21b   : > { %v650_v42 = vadd.f32 %v1235_v41, %v2059_v62  ;;  %v644_v58 = vpop.f32.mrb[9].mxu1  ;;  %1284 = vmatmul.mubr.f32.gmra.mrb[20].mxu0 %v2096_v40  ;;  %v2108_v63 = vadd.f32 %v690_v37, %v1989_v7 }
 0x21c   : > { %v645_v59 = vadd.f32 %v2059_v62, %v644_v58  ;;  %v2104_v61 = vadd.f32 %v689_v18, %v1984_v5 }
 0x21d   : > { %v692_v60 = vmul.f32 %v650_v42, %v1844_v51 }
 0x21e   : > { %v691_v0 = vmul.f32 %v645_v59, %v1839_v50  ;;  %v1238_v1 = vpop.f32.mrb[10].mxu1  ;;  %1286 = vmatprep.mubr.f32.mxu0 %v2104_v61 }
 0x21f   : > { %v660_v2 = vadd.f32 %v1238_v1, %v2059_v62  ;;  %v654_v3 = vpop.f32.mrb[11].mxu1  ;;  %1287 = vmatmul.mubr.f32.gmra.mrb[22].mxu0 %v2108_v63  ;;  %v2119_v6 = vadd.f32 %v692_v60, %v2003_v20 }
 0x220   : > { %v655_v4 = vadd.f32 %v2059_v62, %v654_v3  ;;  %v2116_v5 = vadd.f32 %v691_v0, %v1998_v8 }
 0x221   : > { %v694_v7 = vmul.f32 %v660_v2, %v1852_v53 }
 0x222   : > { %v693_v10 = vmul.f32 %v655_v4, %v1847_v52  ;;  %v1241_v11 = vpop.f32.mrb[12].mxu1  ;;  %1289 = vmatprep.mubr.f32.mxu1 %v2116_v5 }
 0x223   : > { %v670_v13 = vadd.f32 %v1241_v11, %v2059_v62  ;;  %v664_v14 = vpop.f32.mrb[13].mxu1  ;;  %1290 = vmatmul.mubr.f32.vlgmr.msra.gmra.mrb[16].mxu1 %v2119_v6  ;;  %v2132_v22 = vadd.f32 %v694_v7, %v2017_v27 }
 0x224   : > { %v665_v21 = vadd.f32 %v2059_v62, %v664_v14  ;;  %v2128_v8 = vadd.f32 %v693_v10, %v2012_v12 }
 0x225   : > { %v696_v20 = vmul.f32 %v670_v13, %v1860_v55 }
 0x226   : > { %v695_v23 = vmul.f32 %v665_v21, %v1855_v54  ;;  %v1244_v24 = vpop.f32.mrb[14].mxu1  ;;  %1292 = vmatprep.mubr.f32.mxu1 %v2128_v8 }
 0x227   : > { %v680_v25 = vadd.f32 %v1244_v24, %v2059_v62  ;;  %v674_v26 = vpop.f32.mrb[15].mxu1  ;;  %1293 = vmatmul.mubr.f32.gmra.mrb[18].mxu1 %v2132_v22  ;;  %v2144_v27 = vadd.f32 %v696_v20, %v2031_v36 }
 0x228   : > { %v675_v32 = vadd.f32 %v2059_v62, %v674_v26  ;;  %v2140_v12 = vadd.f32 %v695_v23, %v2026_v15  ;;  %v2160_v15 = vld [vmem:[%s2287_s6] ss:$0 sm:$0xff] }
 0x229   : > { %v698_v29 = vmul.f32 %v680_v25, %v1868_v57 }
 0x22a   : > { %v697_v31 = vmul.f32 %v675_v32, %v1863_v56  ;;  %1295 = vmatprep.mubr.f32.mxu1 %v2140_v12 }
 0x22b   : > { %1296 = vmatmul.mubr.f32.gmra.mrb[20].mxu1 %v2144_v27  ;;  %v2153_v34 = vadd.f32 %v698_v29, %v2040_v19 }
 0x22c   : > { %v2150_v33 = vadd.f32 %v697_v31, %v2037_v39 }
 0x22e   : > { %1298 = vmatprep.mubr.f32.mxu1 %v2150_v33 }
 0x22f   : > { %1299 = vmatmul.mubr.f32.gmra.mrb[22].mxu1 %v2153_v34 }
 0x2e6   : > { %v1279_v36 = vpop.f32.mrb[16].mxu0 }
 0x2e7   : > { %v810_v62 = vadd.f32 %v1279_v36, %v2160_v15  ;;  %v804_v35 = vpop.f32.mrb[17].mxu0 }
 0x2e8   : > { %v805_v39 = vadd.f32 %v2160_v15, %v804_v35 }
 0x2e9   : > { %v884_v37 = vmul.f32 %v810_v62, %v1812_v43 }
 0x2ea   : > { %v883_v19 = vmul.f32 %v805_v39, %v1742_v9  ;;  %v1282_v18 = vpop.f32.mrb[18].mxu0 }
 0x2eb   : > { %v900_v41 = vadd.f32 %v884_v37, %v2071_v17  ;;  %v820_v42 = vadd.f32 %v1282_v18, %v2160_v15  ;;  %v814_v58 = vpop.f32.mrb[19].mxu0 }
 0x2ec   : > { %v899_v59 = vadd.f32 %v883_v19, %v2068_v16  ;;  %v815_v60 = vadd.f32 %v2160_v15, %v814_v58 }
 0x2ed   : > { %916 = vst [vmem:[%s2172_s19 + $0x8] sm:$0xff] %v900_v41  ;;  %v886_v9 = vmul.f32 %v820_v42, %v1820_v45 }
 0x2ee   : > { %915 = vst [vmem:[%s2172_s19] sm:$0xff] %v899_v59  ;;  %v885_v43 = vmul.f32 %v815_v60, %v1815_v44  ;;  %v1285_v17 = vpop.f32.mrb[20].mxu0 }
 0x2ef   : > { %v902_v0 = vadd.f32 %v886_v9, %v2084_v28  ;;  %v830_v16 = vadd.f32 %v1285_v17, %v2160_v15  ;;  %v824_v1 = vpop.f32.mrb[21].mxu0 }
 0x2f0   : > { %v901_v2 = vadd.f32 %v885_v43, %v2080_v30  ;;  %v825_v3 = vadd.f32 %v2160_v15, %v824_v1 }
 0x2f1   : > { %918 = vst [vmem:[%s2172_s19 + $0x18] sm:$0xff] %v902_v0  ;;  %v888_v4 = vmul.f32 %v830_v16, %v1828_v47 }
 0x2f2   : > { %917 = vst [vmem:[%s2172_s19 + $0x10] sm:$0xff] %v901_v2  ;;  %v887_v45 = vmul.f32 %v825_v3, %v1823_v46  ;;  %v1288_v7 = vpop.f32.mrb[22].mxu0 }
 0x2f3   : > { %v904_v44 = vadd.f32 %v888_v4, %v2096_v40  ;;  %v840_v28 = vadd.f32 %v1288_v7, %v2160_v15  ;;  %v834_v10 = vpop.f32.mrb[23].mxu0 }
 0x2f4   : > { %v903_v11 = vadd.f32 %v887_v45, %v2092_v38  ;;  %v835_v30 = vadd.f32 %v2160_v15, %v834_v10 }
 0x2f5   : > { %920 = vst [vmem:[%s2172_s19 + $0x28] sm:$0xff] %v904_v44  ;;  %v890_v13 = vmul.f32 %v840_v28, %v1836_v49 }
 0x2f6   : > { %919 = vst [vmem:[%s2172_s19 + $0x20] sm:$0xff] %v903_v11  ;;  %v889_v47 = vmul.f32 %v835_v30, %v1831_v48  ;;  %v1291_v14 = vpop.f32.mrb[16].mxu1 }
 0x2f7   : > { %v906_v46 = vadd.f32 %v890_v13, %v2108_v63  ;;  %v850_v40 = vadd.f32 %v1291_v14, %v2160_v15  ;;  %v844_v21 = vpop.f32.mrb[17].mxu1 }
 0x2f8   : > { %v905_v20 = vadd.f32 %v889_v47, %v2104_v61  ;;  %v845_v38 = vadd.f32 %v2160_v15, %v844_v21 }
 0x2f9   : > { %922 = vst [vmem:[%s2172_s19 + $0x38] sm:$0xff] %v906_v46  ;;  %v892_v23 = vmul.f32 %v850_v40, %v1844_v51 }
 0x2fa   : > { %921 = vst [vmem:[%s2172_s19 + $0x30] sm:$0xff] %v905_v20  ;;  %v891_v49 = vmul.f32 %v845_v38, %v1839_v50  ;;  %v1294_v24 = vpop.f32.mrb[18].mxu1 }
 0x2fb   : > { %v908_v48 = vadd.f32 %v892_v23, %v2119_v6  ;;  %v860_v63 = vadd.f32 %v1294_v24, %v2160_v15  ;;  %v854_v25 = vpop.f32.mrb[19].mxu1 }
 0x2fc   : > { %v907_v26 = vadd.f32 %v891_v49, %v2116_v5  ;;  %v855_v61 = vadd.f32 %v2160_v15, %v854_v25 }
 0x2fd   : > { %924 = vst [vmem:[%s2172_s19 + $0x48] sm:$0xff] %v908_v48  ;;  %v894_v32 = vmul.f32 %v860_v63, %v1852_v53 }
 0x2fe   : > { %923 = vst [vmem:[%s2172_s19 + $0x40] sm:$0xff] %v907_v26  ;;  %v893_v51 = vmul.f32 %v855_v61, %v1847_v52  ;;  %v1297_v29 = vpop.f32.mrb[20].mxu1 }
 0x2ff   : > { %v910_v50 = vadd.f32 %v894_v32, %v2132_v22  ;;  %v870_v6 = vadd.f32 %v1297_v29, %v2160_v15  ;;  %v864_v31 = vpop.f32.mrb[21].mxu1 }
 0x300   : > { %v909_v36 = vadd.f32 %v893_v51, %v2128_v8  ;;  %v865_v5 = vadd.f32 %v2160_v15, %v864_v31 }
 0x301   : > { %926 = vst [vmem:[%s2172_s19 + $0x58] sm:$0xff] %v910_v50  ;;  %v896_v53 = vmul.f32 %v870_v6, %v1860_v55 }
 0x302   : > { %925 = vst [vmem:[%s2172_s19 + $0x50] sm:$0xff] %v909_v36  ;;  %v895_v52 = vmul.f32 %v865_v5, %v1855_v54  ;;  %v1300_v62 = vpop.f32.mrb[22].mxu1 }
 0x303   : > { %v912_v22 = vadd.f32 %v896_v53, %v2144_v27  ;;  %v880_v35 = vadd.f32 %v1300_v62, %v2160_v15  ;;  %v874_v39 = vpop.f32.mrb[23].mxu1 }
 0x304   : > { %v911_v8 = vadd.f32 %v895_v52, %v2140_v12  ;;  %v875_v37 = vadd.f32 %v2160_v15, %v874_v39 }
 0x305   : > { %928 = vst [vmem:[%s2172_s19 + $0x68] sm:$0xff] %v912_v22  ;;  %v898_v55 = vmul.f32 %v880_v35, %v1868_v57 }
 0x306   : > { %927 = vst [vmem:[%s2172_s19 + $0x60] sm:$0xff] %v911_v8  ;;  %v897_v54 = vmul.f32 %v875_v37, %v1863_v56 }
 0x307   : > { %v914_v27 = vadd.f32 %v898_v55, %v2153_v34 }
 0x308   : > { %v913_v12 = vadd.f32 %v897_v54, %v2150_v33 }
 0x309   : > { %930 = vst [vmem:[%s2172_s19 + $0x78] sm:$0xff] %v914_v27 }
 0x30a   : > { %929 = vst [vmem:[%s2172_s19 + $0x70] sm:$0xff] %v913_v12 }
 0x30b   : > { %1506 = shalt.err (!%p1503_p2)
}
 0x30c   : > { %s1507_s23 = scalar_lea.hbm %s2232_s11, 2048  ;;  %s1511_s19 = scalar_lea.hbm %s2288_s7, 4096 }
 0x30d   : > { %p1508_p4 = scmp.ne.s32.totalorder %s2232_s11, %s1507_s23  ;;  %p1512_p9 = scmp.lt.u32.totalorder %s2232_s11, %s2288_s7 }
 0x30e   : > { %p1513_p1 = scmp.lt.u32.totalorder %s1511_s19, %s1507_s23  ;;  %p1515_p6 = scmp.lt.u32.totalorder %s1507_s23, %s2232_s11 }
 0x30f   : > { %p1509_p5 = pnand %p1508_p4, %p2297_p11 }
 0x310   : > { %p1514_p3 = por %p1513_p1, %p1512_p9 }
 0x311   : > { %p1510_p7 = pneg %p1509_p5 }
 0x312   : > { %p1516_p12 = por %p1515_p6, %p1514_p3 }
 0x314   : > { %p1517_p13 = pnand %p1516_p12, %p1510_p7 }
 0x316   : > { %1520 = shalt.err (!%p1517_p13)
}
 0x317   : > { %s1565_s12 = smov 128   ;;  %s1566_s18 = smov 8  }
 0x318   : > { %1415 = dma.vmem_to_hbm [thread:$0]  (%p2297_p11), %s2234_s9, 2048, %s2232_s11, %s932_s28, %s1565_s12, %s1565_s12, %s1566_s18  }
 0x319 PF: > { %s960_s20 = sand.u32 1, %s1547_s24   ;;  %p2298_p8 = scmp.ne.s32.totalorder %s2294_s14, 0 }
 0x31a   : > { %p2299_p10 = scmp.ge.s32.totalorder %s1559_s27, 2  ;;  %s961_s17 = scalar_lea.sflag [#allocation4], %s960_s20 }
 0x31c   : > { %p1422_p0 = pnand %p2299_p10, %p2298_p8 }
 0x31e   : > { %1542 = dma.done.wait (!%p1422_p0), %s961_s17, 2048  }
 0x31f   : > { %1544 = vsyncadd (!%p1422_p0), %s961_s17, 4294965248  ;;  %p20_p2 = scmp.ge.s32.totalorder %s1632_s30, 4   ;;  %s2300_s24 = smov %s1551_s25 }
 0x320   : > { %s2301_s25 = smov %s1555_s26  ;;  %s2302_s26 = smov %s1644_s10 }
 0x321   : > { %s2303_s27 = smov %s1632_s30  ;;  %22 = sbr.rel (!%p20_p2) target bundleno = 5 (0x5), region = 93 }
 0x328   :  { %966 = vsyncpa [#allocation3], 1 }
 0x329   :  { %968 = vsyncpa [#allocation3 + $0x1], 1 }
 0x32a   :  { %969 = vsyncpa [#allocation4], 1 }
 0x32b   :  { %971 = vsyncpa [#allocation4 + $0x1], 1 }

// kernel: tpu_custom_call.1
= control target key start
LH: loop header
LB: loop body
LE: loop exit
PB: predicated region body
PF: predicated region fallthrough
CT: control target
= control target key end

     0   :  { %12 = vsyncpa [#allocation3], 0  ;;  %s2281_s0 = inlined_call_operand.hbm [shape: f32[256,128], index: 0, kind: input, shape index: {}, may-alias: {0,7}]   ;;  %s2282_s1 = inlined_call_operand.vmem [shape: f32[128,128], index: 1, kind: input, shape index: {}]   ;;  %s2283_s2 = inlined_call_operand.vmem [shape: f32[1,128], index: 2, kind: input, shape index: {}]   ;;  %s2284_s3 = inlined_call_operand.vmem [shape: f32[128,128], index: 3, kind: input, shape index: {}]   ;;  %s2285_s4 = inlined_call_operand.vmem [shape: f32[1,128], index: 4, kind: input, shape index: {}]   ;;  %s2286_s5 = inlined_call_operand.vmem [shape: f32[128,128], index: 5, kind: input, shape index: {}]   ;;  %s2287_s6 = inlined_call_operand.vmem [shape: f32[1,128], index: 6, kind: input, shape index: {}]   ;;  %s2288_s7 = inlined_call_operand.hbm [shape: f32[256,128], index: 7, kind: output, shape index: {}, may-alias: {0,7}]  }
   0x1   :  { %14 = vsyncpa [#allocation3 + $0x1], 0 }
   0x2   :  { %15 = vsyncpa [#allocation4], 0 }
   0x3   :  { %17 = vsyncpa [#allocation4 + $0x1], 0  ;;  %s1607_s24 = smov 0   ;;  %s1609_s25 = smov 0  }
   0x4   :  { %s1611_s26 = smov 0   ;;  %s1613_s27 = smov 0  }
   0x5 LB: > { %s1628_s28 = sadd.s32 4294967295, %s1559_s27   ;;  %s1018_s29 = sadd.s32 4294967294, %s1559_s27   ;;  %s1559_s27 = sphi %s1613_s27, %s2303_s27   ;;  %s1555_s26 = sphi %s1611_s26, %s2302_s26   ;;  %s1551_s25 = sphi %s1609_s25, %s2301_s25   ;;  %s1547_s24 = sphi %s1607_s24, %s2300_s24  }
   0x6   : > { %s1632_s30 = sadd.s32 1, %s1559_s27   ;;  %s30_s8 = sadd.s32 1, %s1555_s26 }
   0x7   : > { %s27_s9 = ssub.s32 %s1559_s27, %s1632_s30  ;;  %p37_p0 = scmp.ne.s32.totalorder %s1555_s26, %s1551_s25 }
   0x8   : > { %p28_p1 = scmp.eq.s32.totalorder %s27_s9, 0  ;;  %p38_p2 = scmp.eq.s32.totalorder %s1559_s27, 0 }
   0x9   : > { %p43_p3 = scmp.ne.s32.totalorder %s1551_s25, %s1547_s24  ;;  %p44_p4 = scmp.eq.s32.totalorder %s1628_s28, 0 }
   0xa   : > { %s1644_s10 = scalar_select %p28_p1, %s1555_s26, %s30_s8  }
   0xb   : > { %p1646_p5 = por %p38_p2, %p37_p0  ;;  %p1650_p6 = por %p44_p4, %p43_p3 }
   0xc   : > { %p193_p7 = scmp.eq.s32.totalorder %s1628_s28, 1  ;;  %p199_p8 = scmp.eq.s32.totalorder %s1018_s29, 1 }
   0xd   : > { %p1425_p10 = scmp.lt.s32.totalorder %s1559_s27, 2  ;;  %s237_s15 = sand.u32 1, %s1555_s26  }
   0xe   : > { %p1657_p11 = por %p193_p7, %p37_p0  ;;  %p1661_p12 = por %p199_p8, %p43_p3 }
   0xf   : > { %s1035_s16 = sshll.u32 %s1559_s27, 11  ;;  %s1021_s17 = sshll.u32 %s237_s15, 7 }
  0x10   : > { %s2293_s13 = scalar_select %p1657_p11, 1, 0 }
  0x11   : > { %s2294_s14 = scalar_select %p1661_p12, 1, 0 }
  0x12   : > { %s1670_s20 = scalar_lea.hbm %s2281_s0, %s1035_s16  ;;  %s241_s21 = scalar_lea.vmem [#allocation2], %s1021_s17 }
  0x13   : > { %s248_s22 = sshll.u32 %s241_s21, 4  ;;  %p1674_p13 = pnand %p1425_p10, %p1646_p5  ;;  %s1678_s22 = int_to_ptr.vmem [resolvable:$true] %s248_s22 }
  0x14   : > { %s1680_s29 = scalar_lea.sflag [#allocation3], %s237_s15  ;;  %s1463_s8 = scalar_lea.hbm %s1670_s20, 2048 }
  0x15   : > { %p1464_p0 = scmp.ne.s32.totalorder %s1670_s20, %s1463_s8  ;;  %p1465_p1 = pneg %p1674_p13 }
  0x16   : > { %s1468_s16 = scalar_lea.hbm %s2281_s0, 4096  ;;  %p1469_p4 = scmp.lt.u32.totalorder %s1670_s20, %s2281_s0 }
  0x17   : > { %p1466_p2 = pnand %p1465_p1, %p1464_p0  ;;  %p1470_p5 = scmp.lt.u32.totalorder %s1468_s16, %s1463_s8 }
  0x18   : > { %p1472_p8 = scmp.lt.u32.totalorder %s1463_s8, %s1670_s20 }
  0x19   : > { %p1467_p3 = pneg %p1466_p2  ;;  %p1471_p7 = por %p1470_p5, %p1469_p4 }
  0x1b   : > { %p1473_p10 = por %p1472_p8, %p1471_p7 }
  0x1d   : > { %p1474_p9 = pnand %p1473_p10, %p1467_p3 }
  0x1f   : > { %1477 = shalt.err (!%p1474_p9)
}
  0x20   : > { %s1478_s15 = scalar_lea.vmem %s1678_s22, 2048  ;;  %s1561_s19 = smov [#allocation2]  }
  0x21   : > { %p1479_p0 = scmp.ne.s32.totalorder %s1678_s22, %s1478_s15  ;;  %s1483_s21 = sshll.u32 %s1561_s19, 4  ;;  %s1484_s21 = int_to_ptr.vmem [resolvable:$false] %s1483_s21 }
  0x22   : > { %s1485_s9 = scalar_lea.vmem %s1484_s21, 4096  ;;  %p1486_p11 = scmp.lt.s32.totalorder %s1678_s22, %s1484_s21 }
  0x23   : > { %p1481_p2 = pnand %p1479_p0, %p1465_p1  ;;  %p1487_p4 = scmp.lt.s32.totalorder %s1485_s9, %s1478_s15 }
  0x25   : > { %p1482_p12 = pneg %p1481_p2  ;;  %p1488_p5 = por %p1487_p4, %p1486_p11 }
  0x27   : > { %p1489_p7 = pnand %p1488_p5, %p1482_p12 }
  0x29   : > { %1492 = shalt.err (!%p1489_p7)
}
  0x2a   : > { %s1562_s8 = smov 128   ;;  %s1563_s11 = smov 8  }
  0x2b   : > { %1420 = dma.hbm_to_vmem [thread:$0]  (!%p1674_p13), %s1670_s20, 2048, %s1678_s22, %s1680_s29, %s1562_s8, %s1562_s8, %s1563_s11  }
  0x2c   : > { %p1024_p9 = scmp.ge.s32.totalorder %s1559_s27, 1  ;;  %p256_p1 = scmp.lt.s32.totalorder %s1559_s27, 3 }
  0x2e   : > { %p257_p3 = pnand %p1024_p9, %p256_p1 }
  0x2f   : > { %s1711_s16 = sand.u32 (!%p257_p3), 1, %s1551_s25  }
  0x30   : > { %260 = sbr.rel (%p257_p3) target bundleno = 793 (0x319), region = 48  ;;  %s2290_s17 = sshll.u32 (!%p257_p3), %s1711_s16, 7 }
  0x31   : > { %s263_s18 = scalar_lea.sflag (!%p257_p3), [#allocation3], %s1711_s16  ;;  %s1717_s15 = scalar_lea.vmem (!%p257_p3), [#allocation2], %s2290_s17 }
  0x37   : > { %1538 = dma.done.wait (%p1650_p6), %s263_s18, 2048  }
  0x38   : > { %1540 = vsyncadd (%p1650_p6), %s263_s18, 4294965248  ;;  %v315_v0 = vld [vmem:[%s2282_s1] sm:$0xff]  ;;  %v316_v1 = vld [vmem:[%s2282_s1 + $0x8] sm:$0xff]  ;;  %s1036_s21 = sshll.u32 %s1628_s28, 11  ;;  %s932_s28 = scalar_lea.sflag [#allocation4], %s1711_s16 }
  0x39   : > { %v317_v2 = vld [vmem:[%s2282_s1 + $0x10] sm:$0xff]  ;;  %v1301_v3 = vpack.c.bf16 %v316_v1, %v315_v0  ;;  %v318_v4 = vld [vmem:[%s2282_s1 + $0x18] sm:$0xff]  ;;  %v319_v6 = vld [vmem:[%s2282_s1 + $0x20] sm:$0xff]  ;;  %s2232_s11 = scalar_lea.hbm %s2288_s7, %s1036_s21  ;;  %p2297_p11 = scmp.ne.s32.totalorder %s2293_s13, 0 }
  0x3a   : > { %v1305_v5 = vpack.c.bf16 %v318_v4, %v317_v2  ;;  %v320_v7 = vld [vmem:[%s2282_s1 + $0x28] sm:$0xff]  ;;  %v1742_v9 = vld [vmem:[%s1717_s15] sm:$0xff]  ;;  %v321_v10 = vld [vmem:[%s2282_s1 + $0x30] sm:$0xff]  ;;  %s1564_s20 = smov [#allocation5]  }
  0x3b   : > { %1302 = vmatprep.subr.bf16.mxu0 %v1301_v3  ;;  %v1309_v8 = vpack.c.bf16 %v320_v7, %v319_v6  ;;  %v322_v11 = vld [vmem:[%s2282_s1 + $0x38] sm:$0xff]  ;;  %1165 = vmatprep.mubr.f32.mxu0 %v1742_v9  ;;  %v323_v13 = vld [vmem:[%s2282_s1 + $0x40] sm:$0xff]  ;;  %v324_v14 = vld [vmem:[%s2282_s1 + $0x48] sm:$0xff]  ;;  %s1497_s17 = sshll.u32 %s1564_s20, 4  ;;  %s1498_s17 = int_to_ptr.vmem [resolvable:$false] %s1497_s17 }
  0x3c   : > { %1304 = vmatpush3.bf16.msra.mxu0 %v1301_v3  ;;  %v1313_v12 = vpack.c.bf16 %v322_v11, %v321_v10  ;;  %v515_v15 = vld [vmem:[%s2284_s3] sm:$0xff]  ;;  %v516_v16 = vld [vmem:[%s2284_s3 + $0x8] sm:$0xff]  ;;  %v517_v17 = vld [vmem:[%s2284_s3 + $0x10] sm:$0xff]  ;;  %v1317_v21 = vpack.c.bf16 %v324_v14, %v323_v13  ;;  %s1499_s22 = scalar_lea.vmem %s1498_s17, 4096 }
  0x3d   : > { %1306 = vmatprep.subr.bf16.mxu0 %v1305_v5  ;;  %v518_v18 = vld [vmem:[%s2284_s3 + $0x18] sm:$0xff]  ;;  %v1333_v19 = vpack.c.bf16 %v516_v16, %v515_v15  ;;  %v519_v22 = vld [vmem:[%s2284_s3 + $0x20] sm:$0xff]  ;;  %v520_v23 = vld [vmem:[%s2284_s3 + $0x28] sm:$0xff] }
  0x3e   : > { %v1337_v20 = vpack.c.bf16 %v518_v18, %v517_v17  ;;  %v325_v24 = vld [vmem:[%s2282_s1 + $0x50] sm:$0xff]  ;;  %v326_v25 = vld [vmem:[%s2282_s1 + $0x58] sm:$0xff]  ;;  %v1341_v26 = vpack.c.bf16 %v520_v23, %v519_v22  ;;  %v327_v30 = vld [vmem:[%s2282_s1 + $0x60] sm:$0xff] }
  0x3f   : > { %1334 = vmatprep.subr.bf16.mxu1 %v1333_v19  ;;  %v1321_v27 = vpack.c.bf16 %v326_v25, %v325_v24  ;;  %v521_v28 = vld [vmem:[%s2284_s3 + $0x30] sm:$0xff]  ;;  %v522_v29 = vld [vmem:[%s2284_s3 + $0x38] sm:$0xff]  ;;  %v328_v31 = vld [vmem:[%s2282_s1 + $0x68] sm:$0xff] }
  0x40   : > { %1308 = vmatpush3.bf16.msra.mxu0 %v1305_v5  ;;  %1336 = vmatpush3.bf16.msra.mxu1 %v1333_v19  ;;  %v1345_v32 = vpack.c.bf16 %v522_v29, %v521_v28  ;;  %v1325_v33 = vpack.c.bf16 %v328_v31, %v327_v30  ;;  %v523_v34 = vld [vmem:[%s2284_s3 + $0x40] sm:$0xff]  ;;  %v524_v35 = vld [vmem:[%s2284_s3 + $0x48] sm:$0xff]  ;;  %v329_v36 = vld [vmem:[%s2282_s1 + $0x70] sm:$0xff] }
  0x41   : > { %1310 = vmatprep.subr.bf16.mxu0 %v1309_v8  ;;  %1338 = vmatprep.subr.bf16.mxu1 %v1337_v20  ;;  %v330_v37 = vld [vmem:[%s2282_s1 + $0x78] sm:$0xff]  ;;  %v1349_v38 = vpack.c.bf16 %v524_v35, %v523_v34  ;;  %v525_v40 = vld [vmem:[%s2284_s3 + $0x50] sm:$0xff]  ;;  %v1812_v43 = vld [vmem:[%s1717_s15 + $0x8] sm:$0xff] }
  0x42   : > { %v1329_v39 = vpack.c.bf16 %v330_v37, %v329_v36  ;;  %v526_v41 = vld [vmem:[%s2284_s3 + $0x58] sm:$0xff]  ;;  %v1815_v44 = vld [vmem:[%s1717_s15 + $0x10] sm:$0xff]  ;;  %v1823_v46 = vld [vmem:[%s1717_s15 + $0x20] sm:$0xff] }
  0x43   : > { %v1353_v42 = vpack.c.bf16 %v526_v41, %v525_v40  ;;  %v1820_v45 = vld [vmem:[%s1717_s15 + $0x18] sm:$0xff]  ;;  %v1828_v47 = vld [vmem:[%s1717_s15 + $0x28] sm:$0xff]  ;;  %v1831_v48 = vld [vmem:[%s1717_s15 + $0x30] sm:$0xff] }
  0x44   : > { %1312 = vmatpush3.bf16.msra.mxu0 %v1309_v8  ;;  %1340 = vmatpush3.bf16.msra.mxu1 %v1337_v20  ;;  %v1836_v49 = vld [vmem:[%s1717_s15 + $0x38] sm:$0xff]  ;;  %v1839_v50 = vld [vmem:[%s1717_s15 + $0x40] sm:$0xff]  ;;  %v1844_v51 = vld [vmem:[%s1717_s15 + $0x48] sm:$0xff] }
  0x45   : > { %1314 = vmatprep.subr.bf16.mxu0 %v1313_v12  ;;  %1342 = vmatprep.subr.bf16.mxu1 %v1341_v26  ;;  %v1847_v52 = vld [vmem:[%s1717_s15 + $0x50] sm:$0xff]  ;;  %v1852_v53 = vld [vmem:[%s1717_s15 + $0x58] sm:$0xff]  ;;  %v1855_v54 = vld [vmem:[%s1717_s15 + $0x60] sm:$0xff] }
  0x46   : > { %v1860_v55 = vld [vmem:[%s1717_s15 + $0x68] sm:$0xff]  ;;  %v1863_v56 = vld [vmem:[%s1717_s15 + $0x70] sm:$0xff]  ;;  %v1868_v57 = vld [vmem:[%s1717_s15 + $0x78] sm:$0xff]  ;;  %s2296_s15 = sshll.u32 %s1711_s16, 7 }
  0x47   : > { %v527_v58 = vld [vmem:[%s2284_s3 + $0x60] sm:$0xff]  ;;  %v528_v59 = vld [vmem:[%s2284_s3 + $0x68] sm:$0xff]  ;;  %v529_v61 = vld [vmem:[%s2284_s3 + $0x70] sm:$0xff]  ;;  %s2172_s19 = scalar_lea.vmem [#allocation5], %s2296_s15 }
  0x48   : > { %1316 = vmatpush3.bf16.msra.mxu0 %v1313_v12  ;;  %1344 = vmatpush3.bf16.msra.mxu1 %v1341_v26  ;;  %v1357_v60 = vpack.c.bf16 %v528_v59, %v527_v58  ;;  %v530_v62 = vld [vmem:[%s2284_s3 + $0x78] sm:$0xff]  ;;  %v715_v0 = vld [vmem:[%s2286_s5] sm:$0xff]  ;;  %v716_v1 = vld [vmem:[%s2286_s5 + $0x8] sm:$0xff]  ;;  %s945_s9 = sshll.u32 %s2172_s19, 4  ;;  %s2234_s9 = int_to_ptr.vmem [resolvable:$true] %s945_s9 }
  0x49   : > { %1318 = vmatprep.subr.bf16.mxu0 %v1317_v21  ;;  %1346 = vmatprep.subr.bf16.mxu1 %v1345_v32  ;;  %v1361_v63 = vpack.c.bf16 %v530_v62, %v529_v61  ;;  %v717_v2 = vld [vmem:[%s2286_s5 + $0x10] sm:$0xff]  ;;  %v1365_v3 = vpack.c.bf16 %v716_v1, %v715_v0  ;;  %v718_v4 = vld [vmem:[%s2286_s5 + $0x18] sm:$0xff]  ;;  %v719_v6 = vld [vmem:[%s2286_s5 + $0x20] sm:$0xff]  ;;  %s1493_s18 = scalar_lea.vmem %s2234_s9, 2048  ;;  %p1500_p8 = scmp.lt.s32.totalorder %s2234_s9, %s1498_s17 }
  0x4a   : > { %v1369_v5 = vpack.c.bf16 %v718_v4, %v717_v2  ;;  %v720_v7 = vld [vmem:[%s2286_s5 + $0x28] sm:$0xff]  ;;  %v721_v10 = vld [vmem:[%s2286_s5 + $0x30] sm:$0xff]  ;;  %v722_v11 = vld [vmem:[%s2286_s5 + $0x38] sm:$0xff]  ;;  %p1494_p6 = scmp.ne.s32.totalorder %s2234_s9, %s1493_s18  ;;  %p1501_p10 = scmp.lt.s32.totalorder %s1499_s22, %s1493_s18 }
  0x4b   : > { %v1901_v8 = vpack.c.bf16 %v720_v7, %v719_v6  ;;  %v1910_v12 = vpack.c.bf16 %v722_v11, %v721_v10  ;;  %v723_v13 = vld [vmem:[%s2286_s5 + $0x40] sm:$0xff]  ;;  %v724_v14 = vld [vmem:[%s2286_s5 + $0x48] sm:$0xff]  ;;  %v725_v16 = vld [vmem:[%s2286_s5 + $0x50] sm:$0xff] }
  0x4c   : > { %1320 = vmatpush3.bf16.msra.mxu0 %v1317_v21  ;;  %1348 = vmatpush3.bf16.msra.mxu1 %v1345_v32  ;;  %v1920_v15 = vpack.c.bf16 %v724_v14, %v723_v13  ;;  %v726_v17 = vld [vmem:[%s2286_s5 + $0x58] sm:$0xff]  ;;  %v1938_v19 = vld [vmem:[%s2283_s2] ss:$0 sm:$0xff]  ;;  %p1495_p12 = pnand %p1494_p6, %p2297_p11  ;;  %p1502_p0 = por %p1501_p10, %p1500_p8 }
  0x4d   : > { %1322 = vmatprep.subr.bf16.mxu0 %v1321_v27  ;;  %1350 = vmatprep.subr.bf16.mxu1 %v1349_v38  ;;  %v1930_v18 = vpack.c.bf16 %v726_v17, %v725_v16 }
  0x4e   : > { %p1496_p13 = pneg %p1495_p12 }
  0x50   : > { %1324 = vmatpush3.bf16.msra.mxu0 %v1321_v27  ;;  %1352 = vmatpush3.bf16.msra.mxu1 %v1349_v38  ;;  %p1503_p2 = pnand %p1502_p0, %p1496_p13 }
  0x51   : > { %1326 = vmatprep.subr.bf16.mxu0 %v1325_v33  ;;  %1354 = vmatprep.subr.bf16.mxu1 %v1353_v42 }
  0x54   : > { %1328 = vmatpush3.bf16.msra.mxu0 %v1325_v33  ;;  %1356 = vmatpush3.bf16.msra.mxu1 %v1353_v42 }
  0x55   : > { %1330 = vmatprep.subr.bf16.mxu0 %v1329_v39  ;;  %1358 = vmatprep.subr.bf16.mxu1 %v1357_v60 }
  0x58   : > { %1332 = vmatpush3.bf16.msra.mxu0 %v1329_v39  ;;  %1360 = vmatpush3.bf16.msra.mxu1 %v1357_v60 }
  0x59   : > { %1362 = vmatprep.subr.bf16.mxu1 %v1361_v63  ;;  %1366 = vmatprep.subr.bf16.mxu0 %v1365_v3 }
  0x5b   : > { %1166 = vmatmul.mubr.f32.vlgmr.msra.gmra.mrb[0].mxu0 %v1812_v43 }
  0x5c   : > { %1168 = vmatprep.mubr.f32.mxu0 %v1815_v44  ;;  %1364 = vmatpush3.bf16.msra.mxu1 %v1361_v63 }
  0x5d   : > { %1397 = vmatprep.subr.bf16.mxu1 %v1365_v3  ;;  %1368 = vmatpush3.bf16.msra.mxu0 %v1365_v3 }
  0x5e   : > { %1370 = vmatprep.subr.bf16.mxu0 %v1369_v5 }
  0x5f   : > { %1169 = vmatmul.mubr.f32.gmra.mrb[2].mxu0 %v1820_v45 }
  0x60   : > { %1171 = vmatprep.mubr.f32.mxu0 %v1823_v46 }
  0x61   : > { %1372 = vmatpush3.bf16.msra.mxu0 %v1369_v5 }
  0x62   : > { %1374 = vmatprep.subr.bf16.mxu0 %v1901_v8 }
  0x63   : > { %1172 = vmatmul.mubr.f32.gmra.mrb[4].mxu0 %v1828_v47 }
  0x64   : > { %1174 = vmatprep.mubr.f32.mxu0 %v1831_v48 }
  0x65   : > { %1376 = vmatpush3.bf16.msra.mxu0 %v1901_v8 }
  0x66   : > { %1378 = vmatprep.subr.bf16.mxu0 %v1910_v12 }
  0x67   : > { %1175 = vmatmul.mubr.f32.gmra.mrb[6].mxu0 %v1836_v49 }
  0x68   : > { %1177 = vmatprep.mubr.f32.mxu0 %v1839_v50 }
  0x69   : > { %1380 = vmatpush3.bf16.msra.mxu0 %v1910_v12 }
  0x6a   : > { %1382 = vmatprep.subr.bf16.mxu0 %v1920_v15 }
  0x6b   : > { %1178 = vmatmul.mubr.f32.gmra.mrb[8].mxu0 %v1844_v51 }
  0x6c   : > { %1180 = vmatprep.mubr.f32.mxu0 %v1847_v52 }
  0x6d   : > { %1384 = vmatpush3.bf16.msra.mxu0 %v1920_v15 }
  0x6e   : > { %1386 = vmatprep.subr.bf16.mxu0 %v1930_v18 }
  0x6f   : > { %1181 = vmatmul.mubr.f32.gmra.mrb[10].mxu0 %v1852_v53 }
  0x70   : > { %1183 = vmatprep.mubr.f32.mxu0 %v1855_v54 }
  0x71   : > { %1388 = vmatpush3.bf16.msra.mxu0 %v1930_v18 }
  0x73   : > { %1184 = vmatmul.mubr.f32.gmra.mrb[12].mxu0 %v1860_v55 }
  0x74   : > { %1186 = vmatprep.mubr.f32.mxu0 %v1863_v56 }
  0x77   : > { %1187 = vmatmul.mubr.f32.gmra.mrb[14].mxu0 %v1868_v57 }
 0x12e   : > { %v1167_v20 = vpop.f32.mrb[0].mxu0 }
 0x12f   : > { %v410_v21 = vadd.f32 %v1167_v20, %v1938_v19  ;;  %v404_v22 = vpop.f32.mrb[1].mxu0 }
 0x130   : > { %v405_v23 = vadd.f32 %v1938_v19, %v404_v22 }
 0x131   : > { %v484_v24 = vmul.f32 %v410_v21, %v1812_v43 }
 0x132   : > { %v483_v25 = vmul.f32 %v405_v23, %v1742_v9  ;;  %v1170_v26 = vpop.f32.mrb[2].mxu0 }
 0x133   : > { %v420_v27 = vadd.f32 %v1170_v26, %v1938_v19  ;;  %v414_v28 = vpop.f32.mrb[3].mxu0  ;;  %v1951_v32 = vadd.f32 %v484_v24, %v1812_v43 }
 0x134   : > { %v415_v29 = vadd.f32 %v1938_v19, %v414_v28  ;;  %v1947_v30 = vadd.f32 %v483_v25, %v1742_v9 }
 0x135   : > { %v486_v31 = vmul.f32 %v420_v27, %v1820_v45 }
 0x136   : > { %v485_v33 = vmul.f32 %v415_v29, %v1815_v44  ;;  %v1173_v34 = vpop.f32.mrb[4].mxu0  ;;  %1221 = vmatprep.mubr.f32.mxu1 %v1947_v30 }
 0x137   : > { %v430_v35 = vadd.f32 %v1173_v34, %v1938_v19  ;;  %v424_v36 = vpop.f32.mrb[5].mxu0  ;;  %1222 = vmatmul.mubr.f32.vlgmr.msra.gmra.mrb[0].mxu1 %v1951_v32  ;;  %v1963_v40 = vadd.f32 %v486_v31, %v1820_v45 }
 0x138   : > { %v425_v37 = vadd.f32 %v1938_v19, %v424_v36  ;;  %v1959_v38 = vadd.f32 %v485_v33, %v1815_v44  ;;  %1405 = vmatpush3.bf16.msra.mxu1 %v1365_v3 }
 0x139   : > { %v488_v39 = vmul.f32 %v430_v35, %v1828_v47  ;;  %1398 = vmatprep.subr.bf16.mxu1 %v1369_v5 }
 0x13a   : > { %v487_v41 = vmul.f32 %v425_v37, %v1823_v46  ;;  %v1176_v42 = vpop.f32.mrb[6].mxu0  ;;  %1224 = vmatprep.mubr.f32.mxu1 %v1959_v38 }
 0x13b   : > { %v440_v58 = vadd.f32 %v1176_v42, %v1938_v19  ;;  %v434_v59 = vpop.f32.mrb[7].mxu0  ;;  %1225 = vmatmul.mubr.f32.gmra.mrb[2].mxu1 %v1963_v40  ;;  %v1975_v63 = vadd.f32 %v488_v39, %v1828_v47 }
 0x13c   : > { %v435_v60 = vadd.f32 %v1938_v19, %v434_v59  ;;  %v1971_v61 = vadd.f32 %v487_v41, %v1823_v46  ;;  %1406 = vmatpush3.bf16.msra.mxu1 %v1369_v5  ;;  %v728_v41 = vld [vmem:[%s2286_s5 + $0x68] sm:$0xff]  ;;  %v730_v59 = vld [vmem:[%s2286_s5 + $0x78] sm:$0xff] }
 0x13d   : > { %v490_v62 = vmul.f32 %v440_v58, %v1836_v49  ;;  %1399 = vmatprep.subr.bf16.mxu1 %v1901_v8  ;;  %v729_v58 = vld [vmem:[%s2286_s5 + $0x70] sm:$0xff] }
 0x13e   : > { %v489_v0 = vmul.f32 %v435_v60, %v1831_v48  ;;  %v1179_v1 = vpop.f32.mrb[8].mxu0  ;;  %1227 = vmatprep.mubr.f32.mxu1 %v1971_v61  ;;  %v1393_v60 = vpack.c.bf16 %v730_v59, %v729_v58 }
 0x13f   : > { %v450_v2 = vadd.f32 %v1179_v1, %v1938_v19  ;;  %v444_v3 = vpop.f32.mrb[9].mxu0  ;;  %1228 = vmatmul.mubr.f32.gmra.mrb[4].mxu1 %v1975_v63  ;;  %v1989_v7 = vadd.f32 %v490_v62, %v1836_v49  ;;  %v2059_v62 = vld [vmem:[%s2285_s4] ss:$0 sm:$0xff] }
 0x140   : > { %v445_v4 = vadd.f32 %v1938_v19, %v444_v3  ;;  %v1984_v5 = vadd.f32 %v489_v0, %v1831_v48  ;;  %1407 = vmatpush3.bf16.msra.mxu1 %v1901_v8 }
 0x141   : > { %v492_v6 = vmul.f32 %v450_v2, %v1844_v51  ;;  %1400 = vmatprep.subr.bf16.mxu1 %v1910_v12 }
 0x142   : > { %v491_v10 = vmul.f32 %v445_v4, %v1839_v50  ;;  %v1182_v11 = vpop.f32.mrb[10].mxu0  ;;  %1230 = vmatprep.mubr.f32.mxu1 %v1984_v5 }
 0x143   : > { %v460_v13 = vadd.f32 %v1182_v11, %v1938_v19  ;;  %v454_v14 = vpop.f32.mrb[11].mxu0  ;;  %1231 = vmatmul.mubr.f32.gmra.mrb[6].mxu1 %v1989_v7  ;;  %v2003_v20 = vadd.f32 %v492_v6, %v1844_v51 }
 0x144   : > { %v455_v16 = vadd.f32 %v1938_v19, %v454_v14  ;;  %v1998_v8 = vadd.f32 %v491_v10, %v1839_v50  ;;  %1408 = vmatpush3.bf16.msra.mxu1 %v1910_v12 }
 0x145   : > { %v494_v17 = vmul.f32 %v460_v13, %v1852_v53  ;;  %1401 = vmatprep.subr.bf16.mxu1 %v1920_v15 }
 0x146   : > { %v493_v21 = vmul.f32 %v455_v16, %v1847_v52  ;;  %v1185_v22 = vpop.f32.mrb[12].mxu0  ;;  %1233 = vmatprep.mubr.f32.mxu1 %v1998_v8 }
 0x147   : > { %v470_v23 = vadd.f32 %v1185_v22, %v1938_v19  ;;  %v464_v24 = vpop.f32.mrb[13].mxu0  ;;  %1234 = vmatmul.mubr.f32.gmra.mrb[8].mxu1 %v2003_v20  ;;  %v2017_v27 = vadd.f32 %v494_v17, %v1852_v53 }
 0x148   : > { %v465_v25 = vadd.f32 %v1938_v19, %v464_v24  ;;  %v2012_v12 = vadd.f32 %v493_v21, %v1847_v52  ;;  %1409 = vmatpush3.bf16.msra.mxu1 %v1920_v15 }
 0x149   : > { %v496_v26 = vmul.f32 %v470_v23, %v1860_v55  ;;  %1402 = vmatprep.subr.bf16.mxu1 %v1930_v18 }
 0x14a   : > { %v495_v28 = vmul.f32 %v465_v25, %v1855_v54  ;;  %v1188_v29 = vpop.f32.mrb[14].mxu0  ;;  %1236 = vmatprep.mubr.f32.mxu1 %v2012_v12 }
 0x14b   : > { %v480_v31 = vadd.f32 %v1188_v29, %v1938_v19  ;;  %v474_v33 = vpop.f32.mrb[15].mxu0  ;;  %1237 = vmatmul.mubr.f32.gmra.mrb[10].mxu1 %v2017_v27  ;;  %v2031_v36 = vadd.f32 %v496_v26, %v1860_v55 }
 0x14c   : > { %v475_v34 = vadd.f32 %v1938_v19, %v474_v33  ;;  %v2026_v15 = vadd.f32 %v495_v28, %v1855_v54  ;;  %1410 = vmatpush3.bf16.msra.mxu1 %v1930_v18  ;;  %v727_v18 = vld [vmem:[%s2286_s5 + $0x60] sm:$0xff] }
 0x14d   : > { %v498_v35 = vmul.f32 %v480_v31, %v1868_v57  ;;  %v1389_v42 = vpack.c.bf16 %v728_v41, %v727_v18 }
 0x14e   : > { %v497_v37 = vmul.f32 %v475_v34, %v1863_v56  ;;  %1239 = vmatprep.mubr.f32.mxu1 %v2026_v15 }
 0x14f   : > { %1240 = vmatmul.mubr.f32.gmra.mrb[12].mxu1 %v2031_v36  ;;  %v2040_v19 = vadd.f32 %v498_v35, %v1868_v57  ;;  %1390 = vmatprep.subr.bf16.mxu0 %v1389_v42 }
 0x150   : > { %v2037_v39 = vadd.f32 %v497_v37, %v1863_v56  ;;  %1403 = vmatprep.subr.bf16.mxu1 %v1389_v42  ;;  %1392 = vmatpush3.bf16.msra.mxu0 %v1389_v42 }
 0x151   : > { %1411 = vmatpush3.bf16.msra.mxu1 %v1389_v42  ;;  %1394 = vmatprep.subr.bf16.mxu0 %v1393_v60 }
 0x152   : > { %1242 = vmatprep.mubr.f32.mxu1 %v2037_v39  ;;  %1404 = vmatprep.subr.bf16.mxu1 %v1393_v60 }
 0x153   : > { %1243 = vmatmul.mubr.f32.gmra.mrb[14].mxu1 %v2040_v19 }
 0x154   : > { %1396 = vmatpush3.bf16.msra.mxu0 %v1393_v60 }
 0x155   : > { %1412 = vmatpush3.bf16.msra.mxu1 %v1393_v60 }
 0x20a   : > { %v1223_v0 = vpop.f32.mrb[0].mxu1 }
 0x20b   : > { %v610_v1 = vadd.f32 %v1223_v0, %v2059_v62  ;;  %v604_v2 = vpop.f32.mrb[1].mxu1 }
 0x20c   : > { %v605_v3 = vadd.f32 %v2059_v62, %v604_v2 }
 0x20d   : > { %v684_v4 = vmul.f32 %v610_v1, %v1812_v43 }
 0x20e   : > { %v683_v6 = vmul.f32 %v605_v3, %v1742_v9  ;;  %v1226_v10 = vpop.f32.mrb[2].mxu1 }
 0x20f   : > { %v620_v11 = vadd.f32 %v1226_v10, %v2059_v62  ;;  %v614_v13 = vpop.f32.mrb[3].mxu1  ;;  %v2071_v17 = vadd.f32 %v684_v4, %v1951_v32 }
 0x210   : > { %v615_v14 = vadd.f32 %v2059_v62, %v614_v13  ;;  %v2068_v16 = vadd.f32 %v683_v6, %v1947_v30 }
 0x211   : > { %v686_v21 = vmul.f32 %v620_v11, %v1820_v45 }
 0x212   : > { %v685_v22 = vmul.f32 %v615_v14, %v1815_v44  ;;  %v1229_v23 = vpop.f32.mrb[4].mxu1  ;;  %1277 = vmatprep.mubr.f32.mxu0 %v2068_v16 }
 0x213   : > { %v630_v24 = vadd.f32 %v1229_v23, %v2059_v62  ;;  %v624_v25 = vpop.f32.mrb[5].mxu1  ;;  %1278 = vmatmul.mubr.f32.vlgmr.msra.gmra.mrb[16].mxu0 %v2071_v17  ;;  %v2084_v28 = vadd.f32 %v686_v21, %v1963_v40 }
 0x214   : > { %v625_v26 = vadd.f32 %v2059_v62, %v624_v25  ;;  %v2080_v30 = vadd.f32 %v685_v22, %v1959_v38 }
 0x215   : > { %v688_v32 = vmul.f32 %v630_v24, %v1828_v47 }
 0x216   : > { %v687_v29 = vmul.f32 %v625_v26, %v1823_v46  ;;  %v1232_v31 = vpop.f32.mrb[6].mxu1  ;;  %1280 = vmatprep.mubr.f32.mxu0 %v2080_v30 }
 0x217   : > { %v640_v33 = vadd.f32 %v1232_v31, %v2059_v62  ;;  %v634_v34 = vpop.f32.mrb[7].mxu1  ;;  %1281 = vmatmul.mubr.f32.gmra.mrb[18].mxu0 %v2084_v28  ;;  %v2096_v40 = vadd.f32 %v688_v32, %v1975_v63 }
 0x218   : > { %v635_v35 = vadd.f32 %v2059_v62, %v634_v34  ;;  %v2092_v38 = vadd.f32 %v687_v29, %v1971_v61 }
 0x219   : > { %v690_v37 = vmul.f32 %v640_v33, %v1836_v49 }
 0x21a   : > { %v689_v18 = vmul.f32 %v635_v35, %v1831_v48  ;;  %v1235_v41 = vpop.f32.mrb[8].mxu1  ;;  %1283 = vmatprep.mubr.f32.mxu0 %v2092_v38 }
 0x21b   : > { %v650_v42 = vadd.f32 %v1235_v41, %v2059_v62  ;;  %v644_v58 = vpop.f32.mrb[9].mxu1  ;;  %1284 = vmatmul.mubr.f32.gmra.mrb[20].mxu0 %v2096_v40  ;;  %v2108_v63 = vadd.f32 %v690_v37, %v1989_v7 }
 0x21c   : > { %v645_v59 = vadd.f32 %v2059_v62, %v644_v58  ;;  %v2104_v61 = vadd.f32 %v689_v18, %v1984_v5 }
 0x21d   : > { %v692_v60 = vmul.f32 %v650_v42, %v1844_v51 }
 0x21e   : > { %v691_v0 = vmul.f32 %v645_v59, %v1839_v50  ;;  %v1238_v1 = vpop.f32.mrb[10].mxu1  ;;  %1286 = vmatprep.mubr.f32.mxu0 %v2104_v61 }
 0x21f   : > { %v660_v2 = vadd.f32 %v1238_v1, %v2059_v62  ;;  %v654_v3 = vpop.f32.mrb[11].mxu1  ;;  %1287 = vmatmul.mubr.f32.gmra.mrb[22].mxu0 %v2108_v63  ;;  %v2119_v6 = vadd.f32 %v692_v60, %v2003_v20 }
 0x220   : > { %v655_v4 = vadd.f32 %v2059_v62, %v654_v3  ;;  %v2116_v5 = vadd.f32 %v691_v0, %v1998_v8 }
 0x221   : > { %v694_v7 = vmul.f32 %v660_v2, %v1852_v53 }
 0x222   : > { %v693_v10 = vmul.f32 %v655_v4, %v1847_v52  ;;  %v1241_v11 = vpop.f32.mrb[12].mxu1  ;;  %1289 = vmatprep.mubr.f32.mxu1 %v2116_v5 }
 0x223   : > { %v670_v13 = vadd.f32 %v1241_v11, %v2059_v62  ;;  %v664_v14 = vpop.f32.mrb[13].mxu1  ;;  %1290 = vmatmul.mubr.f32.vlgmr.msra.gmra.mrb[16].mxu1 %v2119_v6  ;;  %v2132_v22 = vadd.f32 %v694_v7, %v2017_v27 }
 0x224   : > { %v665_v21 = vadd.f32 %v2059_v62, %v664_v14  ;;  %v2128_v8 = vadd.f32 %v693_v10, %v2012_v12 }
 0x225   : > { %v696_v20 = vmul.f32 %v670_v13, %v1860_v55 }
 0x226   : > { %v695_v23 = vmul.f32 %v665_v21, %v1855_v54  ;;  %v1244_v24 = vpop.f32.mrb[14].mxu1  ;;  %1292 = vmatprep.mubr.f32.mxu1 %v2128_v8 }
 0x227   : > { %v680_v25 = vadd.f32 %v1244_v24, %v2059_v62  ;;  %v674_v26 = vpop.f32.mrb[15].mxu1  ;;  %1293 = vmatmul.mubr.f32.gmra.mrb[18].mxu1 %v2132_v22  ;;  %v2144_v27 = vadd.f32 %v696_v20, %v2031_v36 }
 0x228   : > { %v675_v32 = vadd.f32 %v2059_v62, %v674_v26  ;;  %v2140_v12 = vadd.f32 %v695_v23, %v2026_v15  ;;  %v2160_v15 = vld [vmem:[%s2287_s6] ss:$0 sm:$0xff] }
 0x229   : > { %v698_v29 = vmul.f32 %v680_v25, %v1868_v57 }
 0x22a   : > { %v697_v31 = vmul.f32 %v675_v32, %v1863_v56  ;;  %1295 = vmatprep.mubr.f32.mxu1 %v2140_v12 }
 0x22b   : > { %1296 = vmatmul.mubr.f32.gmra.mrb[20].mxu1 %v2144_v27  ;;  %v2153_v34 = vadd.f32 %v698_v29, %v2040_v19 }
 0x22c   : > { %v2150_v33 = vadd.f32 %v697_v31, %v2037_v39 }
 0x22e   : > { %1298 = vmatprep.mubr.f32.mxu1 %v2150_v33 }
 0x22f   : > { %1299 = vmatmul.mubr.f32.gmra.mrb[22].mxu1 %v2153_v34 }
 0x2e6   : > { %v1279_v36 = vpop.f32.mrb[16].mxu0 }
 0x2e7   : > { %v810_v62 = vadd.f32 %v1279_v36, %v2160_v15  ;;  %v804_v35 = vpop.f32.mrb[17].mxu0 }
 0x2e8   : > { %v805_v39 = vadd.f32 %v2160_v15, %v804_v35 }
 0x2e9   : > { %v884_v37 = vmul.f32 %v810_v62, %v1812_v43 }
 0x2ea   : > { %v883_v19 = vmul.f32 %v805_v39, %v1742_v9  ;;  %v1282_v18 = vpop.f32.mrb[18].mxu0 }
 0x2eb   : > { %v900_v41 = vadd.f32 %v884_v37, %v2071_v17  ;;  %v820_v42 = vadd.f32 %v1282_v18, %v2160_v15  ;;  %v814_v58 = vpop.f32.mrb[19].mxu0 }
 0x2ec   : > { %v899_v59 = vadd.f32 %v883_v19, %v2068_v16  ;;  %v815_v60 = vadd.f32 %v2160_v15, %v814_v58 }
 0x2ed   : > { %916 = vst [vmem:[%s2172_s19 + $0x8] sm:$0xff] %v900_v41  ;;  %v886_v9 = vmul.f32 %v820_v42, %v1820_v45 }
 0x2ee   : > { %915 = vst [vmem:[%s2172_s19] sm:$0xff] %v899_v59  ;;  %v885_v43 = vmul.f32 %v815_v60, %v1815_v44  ;;  %v1285_v17 = vpop.f32.mrb[20].mxu0 }
 0x2ef   : > { %v902_v0 = vadd.f32 %v886_v9, %v2084_v28  ;;  %v830_v16 = vadd.f32 %v1285_v17, %v2160_v15  ;;  %v824_v1 = vpop.f32.mrb[21].mxu0 }
 0x2f0   : > { %v901_v2 = vadd.f32 %v885_v43, %v2080_v30  ;;  %v825_v3 = vadd.f32 %v2160_v15, %v824_v1 }
 0x2f1   : > { %918 = vst [vmem:[%s2172_s19 + $0x18] sm:$0xff] %v902_v0  ;;  %v888_v4 = vmul.f32 %v830_v16, %v1828_v47 }
 0x2f2   : > { %917 = vst [vmem:[%s2172_s19 + $0x10] sm:$0xff] %v901_v2  ;;  %v887_v45 = vmul.f32 %v825_v3, %v1823_v46  ;;  %v1288_v7 = vpop.f32.mrb[22].mxu0 }
 0x2f3   : > { %v904_v44 = vadd.f32 %v888_v4, %v2096_v40  ;;  %v840_v28 = vadd.f32 %v1288_v7, %v2160_v15  ;;  %v834_v10 = vpop.f32.mrb[23].mxu0 }
 0x2f4   : > { %v903_v11 = vadd.f32 %v887_v45, %v2092_v38  ;;  %v835_v30 = vadd.f32 %v2160_v15, %v834_v10 }
 0x2f5   : > { %920 = vst [vmem:[%s2172_s19 + $0x28] sm:$0xff] %v904_v44  ;;  %v890_v13 = vmul.f32 %v840_v28, %v1836_v49 }
 0x2f6   : > { %919 = vst [vmem:[%s2172_s19 + $0x20] sm:$0xff] %v903_v11  ;;  %v889_v47 = vmul.f32 %v835_v30, %v1831_v48  ;;  %v1291_v14 = vpop.f32.mrb[16].mxu1 }
 0x2f7   : > { %v906_v46 = vadd.f32 %v890_v13, %v2108_v63  ;;  %v850_v40 = vadd.f32 %v1291_v14, %v2160_v15  ;;  %v844_v21 = vpop.f32.mrb[17].mxu1 }
 0x2f8   : > { %v905_v20 = vadd.f32 %v889_v47, %v2104_v61  ;;  %v845_v38 = vadd.f32 %v2160_v15, %v844_v21 }
 0x2f9   : > { %922 = vst [vmem:[%s2172_s19 + $0x38] sm:$0xff] %v906_v46  ;;  %v892_v23 = vmul.f32 %v850_v40, %v1844_v51 }
 0x2fa   : > { %921 = vst [vmem:[%s2172_s19 + $0x30] sm:$0xff] %v905_v20  ;;  %v891_v49 = vmul.f32 %v845_v38, %v1839_v50  ;;  %v1294_v24 = vpop.f32.mrb[18].mxu1 }
 0x2fb   : > { %v908_v48 = vadd.f32 %v892_v23, %v2119_v6  ;;  %v860_v63 = vadd.f32 %v1294_v24, %v2160_v15  ;;  %v854_v25 = vpop.f32.mrb[19].mxu1 }
 0x2fc   : > { %v907_v26 = vadd.f32 %v891_v49, %v2116_v5  ;;  %v855_v61 = vadd.f32 %v2160_v15, %v854_v25 }
 0x2fd   : > { %924 = vst [vmem:[%s2172_s19 + $0x48] sm:$0xff] %v908_v48  ;;  %v894_v32 = vmul.f32 %v860_v63, %v1852_v53 }
 0x2fe   : > { %923 = vst [vmem:[%s2172_s19 + $0x40] sm:$0xff] %v907_v26  ;;  %v893_v51 = vmul.f32 %v855_v61, %v1847_v52  ;;  %v1297_v29 = vpop.f32.mrb[20].mxu1 }
 0x2ff   : > { %v910_v50 = vadd.f32 %v894_v32, %v2132_v22  ;;  %v870_v6 = vadd.f32 %v1297_v29, %v2160_v15  ;;  %v864_v31 = vpop.f32.mrb[21].mxu1 }
 0x300   : > { %v909_v36 = vadd.f32 %v893_v51, %v2128_v8  ;;  %v865_v5 = vadd.f32 %v2160_v15, %v864_v31 }
 0x301   : > { %926 = vst [vmem:[%s2172_s19 + $0x58] sm:$0xff] %v910_v50  ;;  %v896_v53 = vmul.f32 %v870_v6, %v1860_v55 }
 0x302   : > { %925 = vst [vmem:[%s2172_s19 + $0x50] sm:$0xff] %v909_v36  ;;  %v895_v52 = vmul.f32 %v865_v5, %v1855_v54  ;;  %v1300_v62 = vpop.f32.mrb[22].mxu1 }
 0x303   : > { %v912_v22 = vadd.f32 %v896_v53, %v2144_v27  ;;  %v880_v35 = vadd.f32 %v1300_v62, %v2160_v15  ;;  %v874_v39 = vpop.f32.mrb[23].mxu1 }
 0x304   : > { %v911_v8 = vadd.f32 %v895_v52, %v2140_v12  ;;  %v875_v37 = vadd.f32 %v2160_v15, %v874_v39 }
 0x305   : > { %928 = vst [vmem:[%s2172_s19 + $0x68] sm:$0xff] %v912_v22  ;;  %v898_v55 = vmul.f32 %v880_v35, %v1868_v57 }
 0x306   : > { %927 = vst [vmem:[%s2172_s19 + $0x60] sm:$0xff] %v911_v8  ;;  %v897_v54 = vmul.f32 %v875_v37, %v1863_v56 }
 0x307   : > { %v914_v27 = vadd.f32 %v898_v55, %v2153_v34 }
 0x308   : > { %v913_v12 = vadd.f32 %v897_v54, %v2150_v33 }
 0x309   : > { %930 = vst [vmem:[%s2172_s19 + $0x78] sm:$0xff] %v914_v27 }
 0x30a   : > { %929 = vst [vmem:[%s2172_s19 + $0x70] sm:$0xff] %v913_v12 }
 0x30b   : > { %1506 = shalt.err (!%p1503_p2)
}
 0x30c   : > { %s1507_s23 = scalar_lea.hbm %s2232_s11, 2048  ;;  %s1511_s19 = scalar_lea.hbm %s2288_s7, 4096 }
 0x30d   : > { %p1508_p4 = scmp.ne.s32.totalorder %s2232_s11, %s1507_s23  ;;  %p1512_p9 = scmp.lt.u32.totalorder %s2232_s11, %s2288_s7 }
 0x30e   : > { %p1513_p1 = scmp.lt.u32.totalorder %s1511_s19, %s1507_s23  ;;  %p1515_p6 = scmp.lt.u32.totalorder %s1507_s23, %s2232_s11 }
 0x30f   : > { %p1509_p5 = pnand %p1508_p4, %p2297_p11 }
 0x310   : > { %p1514_p3 = por %p1513_p1, %p1512_p9 }
 0x311   : > { %p1510_p7 = pneg %p1509_p5 }
 0x312   : > { %p1516_p12 = por %p1515_p6, %p1514_p3 }
 0x314   : > { %p1517_p13 = pnand %p1516_p12, %p1510_p7 }
 0x316   : > { %1520 = shalt.err (!%p1517_p13)
}
 0x317   : > { %s1565_s12 = smov 128   ;;  %s1566_s18 = smov 8  }
 0x318   : > { %1415 = dma.vmem_to_hbm [thread:$0]  (%p2297_p11), %s2234_s9, 2048, %s2232_s11, %s932_s28, %s1565_s12, %s1565_s12, %s1566_s18  }
 0x319 PF: > { %s960_s20 = sand.u32 1, %s1547_s24   ;;  %p2298_p8 = scmp.ne.s32.totalorder %s2294_s14, 0 }
 0x31a   : > { %p2299_p10 = scmp.ge.s32.totalorder %s1559_s27, 2  ;;  %s961_s17 = scalar_lea.sflag [#allocation4], %s960_s20 }
 0x31c   : > { %p1422_p0 = pnand %p2299_p10, %p2298_p8 }
 0x31e   : > { %1542 = dma.done.wait (!%p1422_p0), %s961_s17, 2048  }
 0x31f   : > { %1544 = vsyncadd (!%p1422_p0), %s961_s17, 4294965248  ;;  %p20_p2 = scmp.ge.s32.totalorder %s1632_s30, 4   ;;  %s2300_s24 = smov %s1551_s25 }
 0x320   : > { %s2301_s25 = smov %s1555_s26  ;;  %s2302_s26 = smov %s1644_s10 }
 0x321   : > { %s2303_s27 = smov %s1632_s30  ;;  %22 = sbr.rel (!%p20_p2) target bundleno = 5 (0x5), region = 93 }
 0x328   :  { %966 = vsyncpa [#allocation3], 1 }
 0x329   :  { %968 = vsyncpa [#allocation3 + $0x1], 1 }
 0x32a   :  { %969 = vsyncpa [#allocation4], 1 }
 0x32b   :  { %971 = vsyncpa [#allocation4 + $0x1], 1 }

</bundles_post_ra>
